<compile_context>
chip_gen: v7x
topology: tpu7x:2x2x1
jax: 0.10.0
libtpu: 0.0.40
codegen_flags: <defaults>
</compile_context>

<pallas_src>
import functools

import jax
import jax.numpy as jnp
from jax.experimental import pallas as pl
from jax.experimental.pallas import tpu as pltpu

HIDDEN = 256
BN_EPS = 1e-5
LANE = 128


def _round_up(n, m):
    return ((n + m - 1) // m) * m


def _cdiv(a, b):
    return -(-a // b)


# --------------------------------------------------------------------------
# In-kernel helpers
# --------------------------------------------------------------------------
def _bn_stats_from_partials(stats_ref, inv_batch):
    """Reduce (n_tiles, 2, N) per-tile (sum, sumsq) partials to BN mean and
    inverse std (biased variance), entirely in-kernel (VPU add + EUP rsqrt)."""
    s = jnp.sum(stats_ref[...], axis=0)                       # (2, N) f32
    mean = s[0:1, :] * inv_batch
    var = jnp.maximum(s[1:2, :] * inv_batch - mean * mean, 0.0)
    invstd = jax.lax.rsqrt(var + BN_EPS)
    return mean, invstd


def _emit_partial_stats(stats_ref, y, tile_m, batch, needs_mask):
    """Write this tile's (sum, sumsq) of y; padded batch rows are masked out
    of BOTH operands so BN stays an exact full-batch BatchNorm."""
    if needs_mask:
        row = (pl.program_id(0) * tile_m
               + jax.lax.broadcasted_iota(jnp.int32, (tile_m, 1), 0))
        ym = jnp.where(row < batch, y, 0.0)
    else:
        ym = y
    stats_ref[0:1, :] = jnp.sum(ym, axis=0, keepdims=True)
    stats_ref[1:2, :] = jnp.sum(ym * ym, axis=0, keepdims=True)


# --------------------------------------------------------------------------
# Kernels
# --------------------------------------------------------------------------
def _make_layer1_kernel(tile_m, batch, needs_mask):
    """z = x @ W1 + b1 (f32 MXU; z is an exposed output) + BN1 partials."""

    def kernel(x_ref, w_ref, b_ref, z_ref, stats_ref):
        z = jnp.dot(x_ref[...], w_ref[...],
                    preferred_element_type=jnp.float32) + b_ref[...]
        z_ref[...] = z
        _emit_partial_stats(stats_ref, z, tile_m, batch, needs_mask)

    return kernel


def _make_bn_relu_linear_kernel(tile_m, batch, needs_mask):
    """y = ReLU(BN(x)) @ W  (bias dropped: the following BN cancels it).

    BN mean/invstd are reduced in-kernel from the previous layer's partials;
    y is stored in bf16 while this layer's partial stats use the f32 y."""
    inv_batch = 1.0 / batch

    def kernel(x_ref, sin_ref, w_ref, y_ref, stats_ref):
        mean, invstd = _bn_stats_from_partials(sin_ref, inv_batch)
        h = jnp.maximum((x_ref[...].astype(jnp.float32) - mean) * invstd, 0.0)
        y = jnp.dot(h.astype(jnp.bfloat16), w_ref[...],
                    preferred_element_type=jnp.float32)
        y_ref[...] = y.astype(y_ref.dtype)          # bf16 activation store
        _emit_partial_stats(stats_ref, y, tile_m, batch, needs_mask)

    return kernel


def _make_bn_relu_kernel(batch):
    """out = ReLU(BN3(h3)); BN3 stats reduced in-kernel from the partials."""
    inv_batch = 1.0 / batch

    def kernel(h_ref, sin_ref, out_ref):
        mean, invstd = _bn_stats_from_partials(sin_ref, inv_batch)
        out_ref[...] = jnp.maximum(
            (h_ref[...].astype(jnp.float32) - mean) * invstd, 0.0)

    return kernel


# --------------------------------------------------------------------------
# BlockSpec / pallas_call helpers
# --------------------------------------------------------------------------
def _row_spec(tile_m, width):
    return pl.BlockSpec((tile_m, width), lambda i: (i, 0),
                        memory_space=pltpu.MemorySpace.VMEM)


def _const_spec(shape):
    # Grid-invariant block: constant index_map => Pallas fetches it once
    # (blocks are only re-DMA'd when the block index changes between steps).
    nd = len(shape)
    return pl.BlockSpec(shape, lambda i, _nd=nd: (0,) * _nd,
                        memory_space=pltpu.MemorySpace.VMEM)


def _stats_out_spec(width):
    # Per-tile partial (sum, sumsq); leading tile dim squeezed in-kernel.
    return pl.BlockSpec((None, 2, width), lambda i: (i, 0, 0),
                        memory_space=pltpu.MemorySpace.VMEM)


def _compiler_params():
    return pltpu.CompilerParams(dimension_semantics=("parallel",),
                                vmem_limit_bytes=32 * 1024 * 1024)


def _layer1(x_pad, w1t, b1, tile_m, batch):
    b_pad, k = x_pad.shape
    n_tiles = b_pad // tile_m
    kernel = _make_layer1_kernel(tile_m, batch, b_pad != batch)
    cost = pl.CostEstimate(
        flops=2 * b_pad * k * HIDDEN,
        transcendentals=0,
        bytes_accessed=4 * (b_pad * k + b_pad * HIDDEN + k * HIDDEN
                            + HIDDEN + n_tiles * 2 * HIDDEN))
    return pl.pallas_call(
        kernel,
        grid=(n_tiles,),
        in_specs=[_row_spec(tile_m, k),
                  _const_spec((k, HIDDEN)),
                  _const_spec((1, HIDDEN))],
        out_specs=(_row_spec(tile_m, HIDDEN), _stats_out_spec(HIDDEN)),
        out_shape=(jax.ShapeDtypeStruct((b_pad, HIDDEN), jnp.float32),
                   jax.ShapeDtypeStruct((n_tiles, 2, HIDDEN), jnp.float32)),
        compiler_params=_compiler_params(),
        cost_estimate=cost,
    )(x_pad, w1t, b1)


def _bn_relu_linear(x_pad, stats_in, w_bf16, tile_m, batch):
    b_pad, k = x_pad.shape
    n_tiles = b_pad // tile_m
    n = w_bf16.shape[1]
    kernel = _make_bn_relu_linear_kernel(tile_m, batch, b_pad != batch)
    cost = pl.CostEstimate(
        flops=2 * b_pad * k * n + 4 * b_pad * k,
        transcendentals=0,
        bytes_accessed=(x_pad.dtype.itemsize * b_pad * k   # activations in
                        + 2 * b_pad * n                    # bf16 out
                        + 2 * k * n                        # bf16 weights
                        + 4 * n_tiles * 2 * (k + n)))      # stats in/out
    return pl.pallas_call(
        kernel,
        grid=(n_tiles,),
        in_specs=[_row_spec(tile_m, k),
                  _const_spec((n_tiles, 2, k)),
                  _const_spec((k, n))],
        out_specs=(_row_spec(tile_m, n), _stats_out_spec(n)),
        out_shape=(jax.ShapeDtypeStruct((b_pad, n), jnp.bfloat16),
                   jax.ShapeDtypeStruct((n_tiles, 2, n), jnp.float32)),
        compiler_params=_compiler_params(),
        cost_estimate=cost,
    )(x_pad, stats_in, w_bf16)


def _bn_relu(h_pad, stats_in, tile_m, batch):
    b_pad, n = h_pad.shape
    n_tiles = b_pad // tile_m
    kernel = _make_bn_relu_kernel(batch)
    cost = pl.CostEstimate(
        flops=4 * b_pad * n, transcendentals=0,
        bytes_accessed=2 * b_pad * n + 4 * b_pad * n + 4 * n_tiles * 2 * n)
    return pl.pallas_call(
        kernel,
        grid=(n_tiles,),
        in_specs=[_row_spec(tile_m, n),
                  _const_spec((n_tiles, 2, n))],
        out_specs=_row_spec(tile_m, n),
        out_shape=jax.ShapeDtypeStruct((b_pad, n), jnp.float32),
        compiler_params=_compiler_params(),
        cost_estimate=cost,
    )(h_pad, stats_in)


# --------------------------------------------------------------------------
# Parameter handling + forward
# --------------------------------------------------------------------------
def init_params(key, c_in, c_out):
    """PyTorch-shaped init: Linear weights are (out_features, in_features)."""
    ks = jax.random.split(key, 6)

    def lin(kw, kb, fan_in, fan_out):
        bound = 1.0 / jnp.sqrt(fan_in)
        w = jax.random.uniform(kw, (fan_out, fan_in), jnp.float32, -bound, bound)
        b = jax.random.uniform(kb, (fan_out,), jnp.float32, -bound, bound)
        return w, b

    w1, b1 = lin(ks[0], ks[1], c_in, HIDDEN)
    w2, b2 = lin(ks[2], ks[3], HIDDEN, HIDDEN)
    w3, b3 = lin(ks[4], ks[5], HIDDEN, c_out)
    return {"w1": w1, "b1": b1, "w2": w2, "b2": b2, "w3": w3, "b3": b3}


def prepare_params(params):
    """One-time glue: transpose to (in,out), zero-pad to 128-lane multiples,
    cast projection-head weights to bf16 and drop b2/b3 (cancelled by BN)."""
    w1, b1, w2, w3 = params["w1"], params["b1"], params["w2"], params["w3"]
    c_in, c_out = w1.shape[1], w3.shape[0]
    c_in_p = _round_up(c_in, LANE)
    c_out_p = _round_up(c_out, LANE)

    w1t = jnp.zeros((c_in_p, HIDDEN), jnp.float32)
    w1t = w1t.at[:c_in, :].set(w1.T.astype(jnp.float32))
    w3t = jnp.zeros((HIDDEN, c_out_p), jnp.bfloat16)
    w3t = w3t.at[:, :c_out].set(w3.T.astype(jnp.bfloat16))

    return {
        "w1t": w1t,                                       # (c_in_p, 256) f32
        "b1": b1.reshape(1, HIDDEN).astype(jnp.float32),  # (1, 256) f32
        "w2t": w2.T.astype(jnp.bfloat16),                 # (256, 256) bf16
        "w3t": w3t,                                       # (256, c_out_p) bf16
        "c_in": c_in,
        "c_out": c_out,
    }


def _pick_tile_m(batch, tile_m):
    if tile_m is not None:
        # Respect caller's choice but keep it a multiple of 16 (bf16 sublane
        # packing / MXU M granularity) and no bigger than the padded batch.
        return max(_round_up(min(tile_m, _round_up(batch, 16)), 16), 16)
    if batch <= 128:
        return _round_up(batch, 16)
    # Target ~512-row tiles (near HBM roofline), >=2 tiles so both v7x
    # TensorCores get work, 128-row multiples, and tile_m ~ B / n_tiles so
    # batch-padding waste stays bounded.
    n_tiles = max(_cdiv(batch, 512), 2)
    return _round_up(_cdiv(batch, n_tiles), 128)


def projection_forward(x, prep, tile_m=None):
    """x: (B, C_in).  prep: output of prepare_params.  Returns (z, out)."""
    B, c_in = x.shape
    assert c_in == prep["c_in"]
    c_in_p = prep["w1t"].shape[0]
    c_out = prep["c_out"]
    c_out_p = prep["w3t"].shape[1]

    tile_m = _pick_tile_m(B, tile_m)
    b_pad = _round_up(B, tile_m)

    xf = x.astype(jnp.float32)
    if (b_pad != B) or (c_in_p != c_in):
        # Only pay this extra XLA copy when shapes are unaligned.
        xf = jnp.zeros((b_pad, c_in_p), jnp.float32).at[:B, :c_in].set(xf)

    # Layer 1 (f32 MXU): z = x @ W1 + b1, plus per-tile BN1 partials of z.
    z_pad, s1 = _layer1(xf, prep["w1t"], prep["b1"], tile_m, B)

    # Layer 2 (bf16 MXU): h2 = ReLU(BN1(z)) @ W2 (bias cancelled by BN2);
    # h2 stored bf16, BN2 partials computed from the f32 accumulator.
    h2_pad, s2 = _bn_relu_linear(z_pad, s1, prep["w2t"], tile_m, B)

    # Layer 3 (bf16 MXU): h3 = ReLU(BN2(h2)) @ W3 (bias cancelled by BN3).
    h3_pad, s3 = _bn_relu_linear(h2_pad, s2, prep["w3t"], tile_m, B)

    # Final BN3 + ReLU (f32 output).
    out_pad = _bn_relu(h3_pad, s3, tile_m, B)

    z = z_pad if b_pad == B else z_pad[:B]
    out = out_pad
    if (b_pad != B) or (c_out_p != c_out):
        out = out_pad[:B, :c_out]
    return z, out


# --------------------------------------------------------------------------
# Demo / sanity check
# --------------------------------------------------------------------------
if __name__ == "__main__":
    key = jax.random.PRNGKey(0)
    k_x, k_p = jax.random.split(key)

    # Small, deliberately non-aligned shapes: exercises lane padding (C_in,
    # C_out), batch padding/masking (20 -> 32 rows) and bf16 intermediates.
    B, C_IN, C_OUT = 20, 20, 96
    x = jax.random.normal(k_x, (B, C_IN), jnp.float32)
    params = init_params(k_p, C_IN, C_OUT)
    prep = prepare_params(params)

    fwd = jax.jit(functools.partial(projection_forward, prep=prep))
    z, out = fwd(x)
    jax.block_until_ready((z, out))

    # Pure-JAX f32 reference (keeps b2/b3, which BatchNorm cancels exactly).
    def ref_forward(x, p):
        hp = jax.lax.Precision.HIGHEST

        def bn_relu(h):
            mean = jnp.mean(h, axis=0, keepdims=True)
            var = jnp.mean((h - mean) ** 2, axis=0, keepdims=True)
            return jnp.maximum((h - mean) * jax.lax.rsqrt(var + BN_EPS), 0.0)

        z = jnp.dot(x, p["w1"].T, precision=hp) + p["b1"]
        h = bn_relu(z)
        h = bn_relu(jnp.dot(h, p["w2"].T, precision=hp) + p["b2"])
        o = bn_relu(jnp.dot(h, p["w3"].T, precision=hp) + p["b3"])
        return z, o

    z_ref, out_ref = ref_forward(x, params)
    assert z.shape == (B, HIDDEN) and out.shape == (B, C_OUT)
    # Layer 1 is f32 on the MXU -> tight tolerance on z.
    assert jnp.allclose(z, z_ref, atol=1e-4, rtol=1e-4), float(
        jnp.max(jnp.abs(z - z_ref)))
    # Layers 2/3 use bf16 MXU operands and bf16 activation storage -> relaxed
    # tolerance on the projection output.
    assert jnp.allclose(out, out_ref, atol=5e-2, rtol=5e-2), float(
        jnp.max(jnp.abs(out - out_ref)))

    print("KERNEL_OK")
</pallas_src>

<mosaic_0001>
module attributes {stable_mosaic.version = 11 : i64} {
  func.func @kernel(%arg0: i32, %arg1: memref<32x256xf32, #tpu.memory_space<vmem>>, %arg2: memref<1x2x256xf32, #tpu.memory_space<vmem>>, %arg3: memref<256x256xbf16, #tpu.memory_space<vmem>>, %arg4: memref<32x256xbf16, #tpu.memory_space<vmem>>, %arg5: memref<1x2x256xf32, #tpu.memory_space<vmem>>) attributes {dimension_semantics = [#tpu.dimension_semantics<parallel>], iteration_bounds = array<i64: 1>, scalar_prefetch = 0 : i64, scratch_operands = 0 : i64, tpu.core_type = #tpu.core_type<tc>, window_params = [{transform_indices = @transform_0, window_bounds = array<i64: 32, 256>}, {pipeline_mode = #tpu.pipeline_mode<synchronous>, transform_indices = @transform_1, window_bounds = array<i64: 1, 2, 256>}, {pipeline_mode = #tpu.pipeline_mode<synchronous>, transform_indices = @transform_2, window_bounds = array<i64: 256, 256>}, {transform_indices = @transform_3, window_bounds = array<i64: 32, 256>}, {transform_indices = @transform_4, window_bounds = array<i64: 1, 2, 256>}]} {
    %c0 = arith.constant 0 : index
    %c0_0 = arith.constant 0 : index
    %c0_1 = arith.constant 0 : index
    %0 = vector.load %arg2[%c0, %c0_0, %c0_1] : memref<1x2x256xf32, #tpu.memory_space<vmem>>, vector<1x2x256xf32>
    %cst = arith.constant dense<0.000000e+00> : vector<2x256xf32>
    %1 = vector.multi_reduction <add>, %0, %cst [0] : vector<1x2x256xf32> to vector<2x256xf32>
    %2 = vector.extract_strided_slice %1 {offsets = [0, 0], sizes = [1, 256], strides = [1, 1]} : vector<2x256xf32> to vector<1x256xf32>
    %cst_2 = arith.constant 5.000000e-02 : f32
    %3 = vector.broadcast %cst_2 : f32 to vector<1x256xf32>
    %4 = arith.mulf %2, %3 : vector<1x256xf32>
    %5 = vector.extract_strided_slice %1 {offsets = [1, 0], sizes = [1, 256], strides = [1, 1]} : vector<2x256xf32> to vector<1x256xf32>
    %cst_3 = arith.constant 5.000000e-02 : f32
    %6 = vector.broadcast %cst_3 : f32 to vector<1x256xf32>
    %7 = arith.mulf %5, %6 : vector<1x256xf32>
    %8 = arith.mulf %4, %4 : vector<1x256xf32>
    %9 = arith.subf %7, %8 : vector<1x256xf32>
    %cst_4 = arith.constant 0.000000e+00 : f32
    %10 = vector.broadcast %cst_4 : f32 to vector<1x256xf32>
    %11 = arith.maximumf %9, %10 : vector<1x256xf32>
    %cst_5 = arith.constant 9.99999974E-6 : f32
    %12 = vector.broadcast %cst_5 : f32 to vector<1x256xf32>
    %13 = arith.addf %11, %12 : vector<1x256xf32>
    %14 = math.rsqrt %13 : vector<1x256xf32>
    %c0_6 = arith.constant 0 : index
    %c0_7 = arith.constant 0 : index
    %15 = vector.load %arg1[%c0_6, %c0_7] : memref<32x256xf32, #tpu.memory_space<vmem>>, vector<32x256xf32>
    %16 = vector.broadcast %4 : vector<1x256xf32> to vector<32x256xf32>
    %17 = arith.subf %15, %16 : vector<32x256xf32>
    %18 = vector.broadcast %14 : vector<1x256xf32> to vector<32x256xf32>
    %19 = arith.mulf %17, %18 : vector<32x256xf32>
    %cst_8 = arith.constant 0.000000e+00 : f32
    %20 = vector.broadcast %cst_8 : f32 to vector<32x256xf32>
    %21 = arith.maximumf %19, %20 : vector<32x256xf32>
    %22 = arith.truncf %21 : vector<32x256xf32> to vector<32x256xbf16>
    %c0_9 = arith.constant 0 : index
    %c0_10 = arith.constant 0 : index
    %23 = vector.load %arg3[%c0_9, %c0_10] : memref<256x256xbf16, #tpu.memory_space<vmem>>, vector<256x256xbf16>
    %cst_11 = arith.constant dense<0.000000e+00> : vector<32x256xf32>
    %24 = tpu.matmul %22, %23, %cst_11 {dimension_numbers = #tpu.dot_dimension_numbers<[1], [0], [0], [1], [0, 0, 1, 1], [], []>} : vector<32x256xbf16>, vector<256x256xbf16>, vector<32x256xf32> -> vector<32x256xf32>
    %25 = arith.truncf %24 : vector<32x256xf32> to vector<32x256xbf16>
    %c0_12 = arith.constant 0 : index
    %c0_13 = arith.constant 0 : index
    %26 = vector.load %arg4[%c0_12, %c0_13] : memref<32x256xbf16, #tpu.memory_space<vmem>>, vector<32x256xbf16>
    tpu.vector_store %arg4[%c0_12, %c0_13], %25 {strides = array<i32>} : memref<32x256xbf16, #tpu.memory_space<vmem>>, vector<32x256xbf16>,
    %c32_i32 = arith.constant 32 : i32
    %27 = arith.muli %arg0, %c32_i32 : i32
    %28 = tpu.iota {dimensions = array<i32: 0>} : vector<32x1xi32>
    %29 = vector.broadcast %27 : i32 to vector<32x1xi32>
    %30 = arith.addi %29, %28 : vector<32x1xi32>
    %c20_i32 = arith.constant 20 : i32
    %31 = vector.broadcast %c20_i32 : i32 to vector<32x1xi32>
    %32 = arith.cmpi slt, %30, %31 : vector<32x1xi32>
    %cst_14 = arith.constant 0.000000e+00 : f32
    %33 = vector.shape_cast %32 : vector<32x1xi1> to vector<32x1xi1>
    %34 = vector.broadcast %33 : vector<32x1xi1> to vector<32x256xi1>
    %35 = vector.broadcast %cst_14 : f32 to vector<32x256xf32>
    %36 = arith.select %34, %24, %35 : vector<32x256xi1>, vector<32x256xf32>
    %cst_15 = arith.constant dense<0.000000e+00> : vector<256xf32>
    %37 = vector.multi_reduction <add>, %36, %cst_15 [0] : vector<32x256xf32> to vector<256xf32>
    %38 = vector.shape_cast %37 : vector<256xf32> to vector<1x256xf32>
    %c0_16 = arith.constant 0 : index
    %c0_17 = arith.constant 0 : index
    %c0_18 = arith.constant 0 : index
    %39 = vector.load %arg5[%c0_16, %c0_17, %c0_18] : memref<1x2x256xf32, #tpu.memory_space<vmem>>, vector<1x1x256xf32>
    %40 = vector.shape_cast %39 : vector<1x1x256xf32> to vector<1x256xf32>
    %41 = vector.shape_cast %38 : vector<1x256xf32> to vector<1x1x256xf32>
    tpu.vector_store %arg5[%c0_16, %c0_17, %c0_18], %41 {strides = array<i32>} : memref<1x2x256xf32, #tpu.memory_space<vmem>>, vector<1x1x256xf32>,
    %42 = arith.mulf %36, %36 : vector<32x256xf32>
    %cst_19 = arith.constant dense<0.000000e+00> : vector<256xf32>
    %43 = vector.multi_reduction <add>, %42, %cst_19 [0] : vector<32x256xf32> to vector<256xf32>
    %44 = vector.shape_cast %43 : vector<256xf32> to vector<1x256xf32>
    %c0_20 = arith.constant 0 : index
    %c1 = arith.constant 1 : index
    %c0_21 = arith.constant 0 : index
    %45 = vector.load %arg5[%c0_20, %c1, %c0_21] : memref<1x2x256xf32, #tpu.memory_space<vmem>>, vector<1x1x256xf32>
    %46 = vector.shape_cast %45 : vector<1x1x256xf32> to vector<1x256xf32>
    %47 = vector.shape_cast %44 : vector<1x256xf32> to vector<1x1x256xf32>
    tpu.vector_store %arg5[%c0_20, %c1, %c0_21], %47 {strides = array<i32>} : memref<1x2x256xf32, #tpu.memory_space<vmem>>, vector<1x1x256xf32>,
    return
  }
  func.func @transform_0(%arg0: i32) -> (i32, i32) {
    %c0_i32 = arith.constant 0 : i32
    %c0_i32_0 = arith.constant 0 : i32
    return %arg0, %c0_i32 : i32, i32
  }
  func.func @transform_1(%arg0: i32) -> (i32, i32, i32) {
    %c0_i32 = arith.constant 0 : i32
    %c0_i32_0 = arith.constant 0 : i32
    %c0_i32_1 = arith.constant 0 : i32
    %c0_i32_2 = arith.constant 0 : i32
    return %c0_i32, %c0_i32_0, %c0_i32_1 : i32, i32, i32
  }
  func.func @transform_2(%arg0: i32) -> (i32, i32) {
    %c0_i32 = arith.constant 0 : i32
    %c0_i32_0 = arith.constant 0 : i32
    %c0_i32_1 = arith.constant 0 : i32
    return %c0_i32, %c0_i32_0 : i32, i32
  }
  func.func @transform_3(%arg0: i32) -> (i32, i32) {
    %c0_i32 = arith.constant 0 : i32
    %c0_i32_0 = arith.constant 0 : i32
    return %arg0, %c0_i32 : i32, i32
  }
  func.func @transform_4(%arg0: i32) -> (i32, i32, i32) {
    %c0_i32 = arith.constant 0 : i32
    %c0_i32_0 = arith.constant 0 : i32
    %c0_i32_1 = arith.constant 0 : i32
    return %arg0, %c0_i32, %c0_i32_0 : i32, i32, i32
  }
}

module attributes {stable_mosaic.version = 11 : i64} {
  func.func @kernel(%arg0: i32, %arg1: memref<32x128xf32, #tpu.memory_space<vmem>>, %arg2: memref<128x256xf32, #tpu.memory_space<vmem>>, %arg3: memref<1x256xf32, #tpu.memory_space<vmem>>, %arg4: memref<32x256xf32, #tpu.memory_space<vmem>>, %arg5: memref<1x2x256xf32, #tpu.memory_space<vmem>>) attributes {dimension_semantics = [#tpu.dimension_semantics<parallel>], iteration_bounds = array<i64: 1>, scalar_prefetch = 0 : i64, scratch_operands = 0 : i64, tpu.core_type = #tpu.core_type<tc>, window_params = [{transform_indices = @transform_0, window_bounds = array<i64: 32, 128>}, {pipeline_mode = #tpu.pipeline_mode<synchronous>, transform_indices = @transform_1, window_bounds = array<i64: 128, 256>}, {pipeline_mode = #tpu.pipeline_mode<synchronous>, transform_indices = @transform_2, window_bounds = array<i64: 1, 256>}, {transform_indices = @transform_3, window_bounds = array<i64: 32, 256>}, {transform_indices = @transform_4, window_bounds = array<i64: 1, 2, 256>}]} {
    %c0 = arith.constant 0 : index
    %c0_0 = arith.constant 0 : index
    %0 = vector.load %arg1[%c0, %c0_0] : memref<32x128xf32, #tpu.memory_space<vmem>>, vector<32x128xf32>
    %c0_1 = arith.constant 0 : index
    %c0_2 = arith.constant 0 : index
    %1 = vector.load %arg2[%c0_1, %c0_2] : memref<128x256xf32, #tpu.memory_space<vmem>>, vector<128x256xf32>
    %cst = arith.constant dense<0.000000e+00> : vector<32x256xf32>
    %2 = tpu.matmul %0, %1, %cst {dimension_numbers = #tpu.dot_dimension_numbers<[1], [0], [0], [1], [0, 0, 1, 1], [], []>} : vector<32x128xf32>, vector<128x256xf32>, vector<32x256xf32> -> vector<32x256xf32>
    %c0_3 = arith.constant 0 : index
    %c0_4 = arith.constant 0 : index
    %3 = vector.load %arg3[%c0_3, %c0_4] : memref<1x256xf32, #tpu.memory_space<vmem>>, vector<1x256xf32>
    %4 = vector.broadcast %3 : vector<1x256xf32> to vector<32x256xf32>
    %5 = arith.addf %2, %4 : vector<32x256xf32>
    %c0_5 = arith.constant 0 : index
    %c0_6 = arith.constant 0 : index
    %6 = vector.load %arg4[%c0_5, %c0_6] : memref<32x256xf32, #tpu.memory_space<vmem>>, vector<32x256xf32>
    tpu.vector_store %arg4[%c0_5, %c0_6], %5 {strides = array<i32>} : memref<32x256xf32, #tpu.memory_space<vmem>>, vector<32x256xf32>,
    %c32_i32 = arith.constant 32 : i32
    %7 = arith.muli %arg0, %c32_i32 : i32
    %8 = tpu.iota {dimensions = array<i32: 0>} : vector<32x1xi32>
    %9 = vector.broadcast %7 : i32 to vector<32x1xi32>
    %10 = arith.addi %9, %8 : vector<32x1xi32>
    %c20_i32 = arith.constant 20 : i32
    %11 = vector.broadcast %c20_i32 : i32 to vector<32x1xi32>
    %12 = arith.cmpi slt, %10, %11 : vector<32x1xi32>
    %cst_7 = arith.constant 0.000000e+00 : f32
    %13 = vector.shape_cast %12 : vector<32x1xi1> to vector<32x1xi1>
    %14 = vector.broadcast %13 : vector<32x1xi1> to vector<32x256xi1>
    %15 = vector.broadcast %cst_7 : f32 to vector<32x256xf32>
    %16 = arith.select %14, %5, %15 : vector<32x256xi1>, vector<32x256xf32>
    %cst_8 = arith.constant dense<0.000000e+00> : vector<256xf32>
    %17 = vector.multi_reduction <add>, %16, %cst_8 [0] : vector<32x256xf32> to vector<256xf32>
    %18 = vector.shape_cast %17 : vector<256xf32> to vector<1x256xf32>
    %c0_9 = arith.constant 0 : index
    %c0_10 = arith.constant 0 : index
    %c0_11 = arith.constant 0 : index
    %19 = vector.load %arg5[%c0_9, %c0_10, %c0_11] : memref<1x2x256xf32, #tpu.memory_space<vmem>>, vector<1x1x256xf32>
    %20 = vector.shape_cast %19 : vector<1x1x256xf32> to vector<1x256xf32>
    %21 = vector.shape_cast %18 : vector<1x256xf32> to vector<1x1x256xf32>
    tpu.vector_store %arg5[%c0_9, %c0_10, %c0_11], %21 {strides = array<i32>} : memref<1x2x256xf32, #tpu.memory_space<vmem>>, vector<1x1x256xf32>,
    %22 = arith.mulf %16, %16 : vector<32x256xf32>
    %cst_12 = arith.constant dense<0.000000e+00> : vector<256xf32>
    %23 = vector.multi_reduction <add>, %22, %cst_12 [0] : vector<32x256xf32> to vector<256xf32>
    %24 = vector.shape_cast %23 : vector<256xf32> to vector<1x256xf32>
    %c0_13 = arith.constant 0 : index
    %c1 = arith.constant 1 : index
    %c0_14 = arith.constant 0 : index
    %25 = vector.load %arg5[%c0_13, %c1, %c0_14] : memref<1x2x256xf32, #tpu.memory_space<vmem>>, vector<1x1x256xf32>
    %26 = vector.shape_cast %25 : vector<1x1x256xf32> to vector<1x256xf32>
    %27 = vector.shape_cast %24 : vector<1x256xf32> to vector<1x1x256xf32>
    tpu.vector_store %arg5[%c0_13, %c1, %c0_14], %27 {strides = array<i32>} : memref<1x2x256xf32, #tpu.memory_space<vmem>>, vector<1x1x256xf32>,
    return
  }
  func.func @transform_0(%arg0: i32) -> (i32, i32) {
    %c0_i32 = arith.constant 0 : i32
    %c0_i32_0 = arith.constant 0 : i32
    return %arg0, %c0_i32 : i32, i32
  }
  func.func @transform_1(%arg0: i32) -> (i32, i32) {
    %c0_i32 = arith.constant 0 : i32
    %c0_i32_0 = arith.constant 0 : i32
    %c0_i32_1 = arith.constant 0 : i32
    return %c0_i32, %c0_i32_0 : i32, i32
  }
  func.func @transform_2(%arg0: i32) -> (i32, i32) {
    %c0_i32 = arith.constant 0 : i32
    %c0_i32_0 = arith.constant 0 : i32
    %c0_i32_1 = arith.constant 0 : i32
    return %c0_i32, %c0_i32_0 : i32, i32
  }
  func.func @transform_3(%arg0: i32) -> (i32, i32) {
    %c0_i32 = arith.constant 0 : i32
    %c0_i32_0 = arith.constant 0 : i32
    return %arg0, %c0_i32 : i32, i32
  }
  func.func @transform_4(%arg0: i32) -> (i32, i32, i32) {
    %c0_i32 = arith.constant 0 : i32
    %c0_i32_0 = arith.constant 0 : i32
    %c0_i32_1 = arith.constant 0 : i32
    return %arg0, %c0_i32, %c0_i32_0 : i32, i32, i32
  }
}

module attributes {stable_mosaic.version = 11 : i64} {
  func.func @kernel(%arg0: i32, %arg1: memref<32x128xbf16, #tpu.memory_space<vmem>>, %arg2: memref<1x2x128xf32, #tpu.memory_space<vmem>>, %arg3: memref<32x128xf32, #tpu.memory_space<vmem>>) attributes {dimension_semantics = [#tpu.dimension_semantics<parallel>], iteration_bounds = array<i64: 1>, scalar_prefetch = 0 : i64, scratch_operands = 0 : i64, tpu.core_type = #tpu.core_type<tc>, window_params = [{transform_indices = @transform_0, window_bounds = array<i64: 32, 128>}, {pipeline_mode = #tpu.pipeline_mode<synchronous>, transform_indices = @transform_1, window_bounds = array<i64: 1, 2, 128>}, {transform_indices = @transform_2, window_bounds = array<i64: 32, 128>}]} {
    %c0 = arith.constant 0 : index
    %c0_0 = arith.constant 0 : index
    %c0_1 = arith.constant 0 : index
    %0 = vector.load %arg2[%c0, %c0_0, %c0_1] : memref<1x2x128xf32, #tpu.memory_space<vmem>>, vector<1x2x128xf32>
    %cst = arith.constant dense<0.000000e+00> : vector<2x128xf32>
    %1 = vector.multi_reduction <add>, %0, %cst [0] : vector<1x2x128xf32> to vector<2x128xf32>
    %2 = vector.extract_strided_slice %1 {offsets = [0, 0], sizes = [1, 128], strides = [1, 1]} : vector<2x128xf32> to vector<1x128xf32>
    %cst_2 = arith.constant 5.000000e-02 : f32
    %3 = vector.broadcast %cst_2 : f32 to vector<1x128xf32>
    %4 = arith.mulf %2, %3 : vector<1x128xf32>
    %5 = vector.extract_strided_slice %1 {offsets = [1, 0], sizes = [1, 128], strides = [1, 1]} : vector<2x128xf32> to vector<1x128xf32>
    %cst_3 = arith.constant 5.000000e-02 : f32
    %6 = vector.broadcast %cst_3 : f32 to vector<1x128xf32>
    %7 = arith.mulf %5, %6 : vector<1x128xf32>
    %8 = arith.mulf %4, %4 : vector<1x128xf32>
    %9 = arith.subf %7, %8 : vector<1x128xf32>
    %cst_4 = arith.constant 0.000000e+00 : f32
    %10 = vector.broadcast %cst_4 : f32 to vector<1x128xf32>
    %11 = arith.maximumf %9, %10 : vector<1x128xf32>
    %cst_5 = arith.constant 9.99999974E-6 : f32
    %12 = vector.broadcast %cst_5 : f32 to vector<1x128xf32>
    %13 = arith.addf %11, %12 : vector<1x128xf32>
    %14 = math.rsqrt %13 : vector<1x128xf32>
    %c0_6 = arith.constant 0 : index
    %c0_7 = arith.constant 0 : index
    %15 = vector.load %arg1[%c0_6, %c0_7] : memref<32x128xbf16, #tpu.memory_space<vmem>>, vector<32x128xbf16>
    %16 = arith.extf %15 : vector<32x128xbf16> to vector<32x128xf32>
    %17 = vector.broadcast %4 : vector<1x128xf32> to vector<32x128xf32>
    %18 = arith.subf %16, %17 : vector<32x128xf32>
    %19 = vector.broadcast %14 : vector<1x128xf32> to vector<32x128xf32>
    %20 = arith.mulf %18, %19 : vector<32x128xf32>
    %cst_8 = arith.constant 0.000000e+00 : f32
    %21 = vector.broadcast %cst_8 : f32 to vector<32x128xf32>
    %22 = arith.maximumf %20, %21 : vector<32x128xf32>
    %c0_9 = arith.constant 0 : index
    %c0_10 = arith.constant 0 : index
    %23 = vector.load %arg3[%c0_9, %c0_10] : memref<32x128xf32, #tpu.memory_space<vmem>>, vector<32x128xf32>
    tpu.vector_store %arg3[%c0_9, %c0_10], %22 {strides = array<i32>} : memref<32x128xf32, #tpu.memory_space<vmem>>, vector<32x128xf32>,
    return
  }
  func.func @transform_0(%arg0: i32) -> (i32, i32) {
    %c0_i32 = arith.constant 0 : i32
    %c0_i32_0 = arith.constant 0 : i32
    return %arg0, %c0_i32 : i32, i32
  }
  func.func @transform_1(%arg0: i32) -> (i32, i32, i32) {
    %c0_i32 = arith.constant 0 : i32
    %c0_i32_0 = arith.constant 0 : i32
    %c0_i32_1 = arith.constant 0 : i32
    %c0_i32_2 = arith.constant 0 : i32
    return %c0_i32, %c0_i32_0, %c0_i32_1 : i32, i32, i32
  }
  func.func @transform_2(%arg0: i32) -> (i32, i32) {
    %c0_i32 = arith.constant 0 : i32
    %c0_i32_0 = arith.constant 0 : i32
    return %arg0, %c0_i32 : i32, i32
  }
}

module attributes {stable_mosaic.version = 11 : i64} {
  func.func @kernel(%arg0: i32, %arg1: memref<32x256xbf16, #tpu.memory_space<vmem>>, %arg2: memref<1x2x256xf32, #tpu.memory_space<vmem>>, %arg3: memref<256x128xbf16, #tpu.memory_space<vmem>>, %arg4: memref<32x128xbf16, #tpu.memory_space<vmem>>, %arg5: memref<1x2x128xf32, #tpu.memory_space<vmem>>) attributes {dimension_semantics = [#tpu.dimension_semantics<parallel>], iteration_bounds = array<i64: 1>, scalar_prefetch = 0 : i64, scratch_operands = 0 : i64, tpu.core_type = #tpu.core_type<tc>, window_params = [{transform_indices = @transform_0, window_bounds = array<i64: 32, 256>}, {pipeline_mode = #tpu.pipeline_mode<synchronous>, transform_indices = @transform_1, window_bounds = array<i64: 1, 2, 256>}, {pipeline_mode = #tpu.pipeline_mode<synchronous>, transform_indices = @transform_2, window_bounds = array<i64: 256, 128>}, {transform_indices = @transform_3, window_bounds = array<i64: 32, 128>}, {transform_indices = @transform_4, window_bounds = array<i64: 1, 2, 128>}]} {
    %c0 = arith.constant 0 : index
    %c0_0 = arith.constant 0 : index
    %c0_1 = arith.constant 0 : index
    %0 = vector.load %arg2[%c0, %c0_0, %c0_1] : memref<1x2x256xf32, #tpu.memory_space<vmem>>, vector<1x2x256xf32>
    %cst = arith.constant dense<0.000000e+00> : vector<2x256xf32>
    %1 = vector.multi_reduction <add>, %0, %cst [0] : vector<1x2x256xf32> to vector<2x256xf32>
    %2 = vector.extract_strided_slice %1 {offsets = [0, 0], sizes = [1, 256], strides = [1, 1]} : vector<2x256xf32> to vector<1x256xf32>
    %cst_2 = arith.constant 5.000000e-02 : f32
    %3 = vector.broadcast %cst_2 : f32 to vector<1x256xf32>
    %4 = arith.mulf %2, %3 : vector<1x256xf32>
    %5 = vector.extract_strided_slice %1 {offsets = [1, 0], sizes = [1, 256], strides = [1, 1]} : vector<2x256xf32> to vector<1x256xf32>
    %cst_3 = arith.constant 5.000000e-02 : f32
    %6 = vector.broadcast %cst_3 : f32 to vector<1x256xf32>
    %7 = arith.mulf %5, %6 : vector<1x256xf32>
    %8 = arith.mulf %4, %4 : vector<1x256xf32>
    %9 = arith.subf %7, %8 : vector<1x256xf32>
    %cst_4 = arith.constant 0.000000e+00 : f32
    %10 = vector.broadcast %cst_4 : f32 to vector<1x256xf32>
    %11 = arith.maximumf %9, %10 : vector<1x256xf32>
    %cst_5 = arith.constant 9.99999974E-6 : f32
    %12 = vector.broadcast %cst_5 : f32 to vector<1x256xf32>
    %13 = arith.addf %11, %12 : vector<1x256xf32>
    %14 = math.rsqrt %13 : vector<1x256xf32>
    %c0_6 = arith.constant 0 : index
    %c0_7 = arith.constant 0 : index
    %15 = vector.load %arg1[%c0_6, %c0_7] : memref<32x256xbf16, #tpu.memory_space<vmem>>, vector<32x256xbf16>
    %16 = arith.extf %15 : vector<32x256xbf16> to vector<32x256xf32>
    %17 = vector.broadcast %4 : vector<1x256xf32> to vector<32x256xf32>
    %18 = arith.subf %16, %17 : vector<32x256xf32>
    %19 = vector.broadcast %14 : vector<1x256xf32> to vector<32x256xf32>
    %20 = arith.mulf %18, %19 : vector<32x256xf32>
    %cst_8 = arith.constant 0.000000e+00 : f32
    %21 = vector.broadcast %cst_8 : f32 to vector<32x256xf32>
    %22 = arith.maximumf %20, %21 : vector<32x256xf32>
    %23 = arith.truncf %22 : vector<32x256xf32> to vector<32x256xbf16>
    %c0_9 = arith.constant 0 : index
    %c0_10 = arith.constant 0 : index
    %24 = vector.load %arg3[%c0_9, %c0_10] : memref<256x128xbf16, #tpu.memory_space<vmem>>, vector<256x128xbf16>
    %cst_11 = arith.constant dense<0.000000e+00> : vector<32x128xf32>
    %25 = tpu.matmul %23, %24, %cst_11 {dimension_numbers = #tpu.dot_dimension_numbers<[1], [0], [0], [1], [0, 0, 1, 1], [], []>} : vector<32x256xbf16>, vector<256x128xbf16>, vector<32x128xf32> -> vector<32x128xf32>
    %26 = arith.truncf %25 : vector<32x128xf32> to vector<32x128xbf16>
    %c0_12 = arith.constant 0 : index
    %c0_13 = arith.constant 0 : index
    %27 = vector.load %arg4[%c0_12, %c0_13] : memref<32x128xbf16, #tpu.memory_space<vmem>>, vector<32x128xbf16>
    tpu.vector_store %arg4[%c0_12, %c0_13], %26 {strides = array<i32>} : memref<32x128xbf16, #tpu.memory_space<vmem>>, vector<32x128xbf16>,
    %c32_i32 = arith.constant 32 : i32
    %28 = arith.muli %arg0, %c32_i32 : i32
    %29 = tpu.iota {dimensions = array<i32: 0>} : vector<32x1xi32>
    %30 = vector.broadcast %28 : i32 to vector<32x1xi32>
    %31 = arith.addi %30, %29 : vector<32x1xi32>
    %c20_i32 = arith.constant 20 : i32
    %32 = vector.broadcast %c20_i32 : i32 to vector<32x1xi32>
    %33 = arith.cmpi slt, %31, %32 : vector<32x1xi32>
    %cst_14 = arith.constant 0.000000e+00 : f32
    %34 = vector.shape_cast %33 : vector<32x1xi1> to vector<32x1xi1>
    %35 = vector.broadcast %34 : vector<32x1xi1> to vector<32x128xi1>
    %36 = vector.broadcast %cst_14 : f32 to vector<32x128xf32>
    %37 = arith.select %35, %25, %36 : vector<32x128xi1>, vector<32x128xf32>
    %cst_15 = arith.constant dense<0.000000e+00> : vector<128xf32>
    %38 = vector.multi_reduction <add>, %37, %cst_15 [0] : vector<32x128xf32> to vector<128xf32>
    %39 = vector.shape_cast %38 : vector<128xf32> to vector<1x128xf32>
    %c0_16 = arith.constant 0 : index
    %c0_17 = arith.constant 0 : index
    %c0_18 = arith.constant 0 : index
    %40 = vector.load %arg5[%c0_16, %c0_17, %c0_18] : memref<1x2x128xf32, #tpu.memory_space<vmem>>, vector<1x1x128xf32>
    %41 = vector.shape_cast %40 : vector<1x1x128xf32> to vector<1x128xf32>
    %42 = vector.shape_cast %39 : vector<1x128xf32> to vector<1x1x128xf32>
    tpu.vector_store %arg5[%c0_16, %c0_17, %c0_18], %42 {strides = array<i32>} : memref<1x2x128xf32, #tpu.memory_space<vmem>>, vector<1x1x128xf32>,
    %43 = arith.mulf %37, %37 : vector<32x128xf32>
    %cst_19 = arith.constant dense<0.000000e+00> : vector<128xf32>
    %44 = vector.multi_reduction <add>, %43, %cst_19 [0] : vector<32x128xf32> to vector<128xf32>
    %45 = vector.shape_cast %44 : vector<128xf32> to vector<1x128xf32>
    %c0_20 = arith.constant 0 : index
    %c1 = arith.constant 1 : index
    %c0_21 = arith.constant 0 : index
    %46 = vector.load %arg5[%c0_20, %c1, %c0_21] : memref<1x2x128xf32, #tpu.memory_space<vmem>>, vector<1x1x128xf32>
    %47 = vector.shape_cast %46 : vector<1x1x128xf32> to vector<1x128xf32>
    %48 = vector.shape_cast %45 : vector<1x128xf32> to vector<1x1x128xf32>
    tpu.vector_store %arg5[%c0_20, %c1, %c0_21], %48 {strides = array<i32>} : memref<1x2x128xf32, #tpu.memory_space<vmem>>, vector<1x1x128xf32>,
    return
  }
  func.func @transform_0(%arg0: i32) -> (i32, i32) {
    %c0_i32 = arith.constant 0 : i32
    %c0_i32_0 = arith.constant 0 : i32
    return %arg0, %c0_i32 : i32, i32
  }
  func.func @transform_1(%arg0: i32) -> (i32, i32, i32) {
    %c0_i32 = arith.constant 0 : i32
    %c0_i32_0 = arith.constant 0 : i32
    %c0_i32_1 = arith.constant 0 : i32
    %c0_i32_2 = arith.constant 0 : i32
    return %c0_i32, %c0_i32_0, %c0_i32_1 : i32, i32, i32
  }
  func.func @transform_2(%arg0: i32) -> (i32, i32) {
    %c0_i32 = arith.constant 0 : i32
    %c0_i32_0 = arith.constant 0 : i32
    %c0_i32_1 = arith.constant 0 : i32
    return %c0_i32, %c0_i32_0 : i32, i32
  }
  func.func @transform_3(%arg0: i32) -> (i32, i32) {
    %c0_i32 = arith.constant 0 : i32
    %c0_i32_0 = arith.constant 0 : i32
    return %arg0, %c0_i32 : i32, i32
  }
  func.func @transform_4(%arg0: i32) -> (i32, i32, i32) {
    %c0_i32 = arith.constant 0 : i32
    %c0_i32_0 = arith.constant 0 : i32
    %c0_i32_1 = arith.constant 0 : i32
    return %arg0, %c0_i32, %c0_i32_0 : i32, i32, i32
  }
}

</mosaic_0001>

<bundles_post_ra>
// kernel: projection_forward.5
= control target key start
LH: loop header
LB: loop body
LE: loop exit
PB: predicated region body
PF: predicated region fallthrough
CT: control target
= control target key end

     0   :  { %v36_v18 = vlaneseq  ;;  %s801_s2 = inlined_call_operand.vmem [shape: bf16[256,256], index: 2, kind: input, shape index: {}]   ;;  %s802_s1 = inlined_call_operand.vmem [shape: f32[1,2,256], index: 1, kind: input, shape index: {}]   ;;  %s803_s0 = inlined_call_operand.vmem [shape: f32[32,256], index: 0, kind: input, shape index: {}]   ;;  %s804_s3 = inlined_call_operand.vmem [shape: bf16[32,256], index: 3, kind: output, shape index: {0}]   ;;  %s805_s4 = inlined_call_operand.vmem [shape: f32[1,2,256], index: 4, kind: output, shape index: {1}]  }
   0x1   :  { %v574_v0 = vld [vmem:[%s801_s2 + $0x4] ss:$8 sps:$4 sm:$0xff]   ;;  %v576_v1 = vld [vmem:[%s801_s2] ss:$8 sps:$4 sm:$0xff]   ;;  %v577_v2 = vld [vmem:[%s801_s2 + $0x14] ss:$8 sps:$4 sm:$0xff]  }
   0x2   :  { %293 = vmatprep.subr.bf16.mxu0 %v574_v0  ;;  %541 = vmatprep.subr.bf16.mxu1 %v574_v0  ;;  %v579_v3 = vld [vmem:[%s801_s2 + $0x10] ss:$8 sps:$4 sm:$0xff]   ;;  %v580_v4 = vld [vmem:[%s801_s2 + $0x24] ss:$8 sps:$4 sm:$0xff]   ;;  %v582_v5 = vld [vmem:[%s801_s2 + $0x20] ss:$8 sps:$4 sm:$0xff]  }
   0x3   :  { %294 = vmatpush1.bf16.msra.mxu0 %v576_v1  ;;  %557 = vmatpush1.bf16.msra.mxu1 %v576_v1  ;;  %v583_v6 = vld [vmem:[%s801_s2 + $0x34] ss:$8 sps:$4 sm:$0xff]   ;;  %v585_v7 = vld [vmem:[%s801_s2 + $0x30] ss:$8 sps:$4 sm:$0xff]   ;;  %v586_v8 = vld [vmem:[%s801_s2 + $0x44] ss:$8 sps:$4 sm:$0xff]  }
   0x4   :  { %295 = vmatprep.subr.bf16.mxu0 %v577_v2  ;;  %542 = vmatprep.subr.bf16.mxu1 %v577_v2  ;;  %v588_v9 = vld [vmem:[%s801_s2 + $0x40] ss:$8 sps:$4 sm:$0xff]   ;;  %v589_v10 = vld [vmem:[%s801_s2 + $0x54] ss:$8 sps:$4 sm:$0xff]   ;;  %v591_v11 = vld [vmem:[%s801_s2 + $0x50] ss:$8 sps:$4 sm:$0xff]  }
   0x5   :  { %v592_v12 = vld [vmem:[%s801_s2 + $0x64] ss:$8 sps:$4 sm:$0xff]   ;;  %v16_v13 = vld [vmem:[%s802_s1] sm:$0xf]  ;;  %v595_v16 = vld [vmem:[%s801_s2 + $0x74] ss:$8 sps:$4 sm:$0xff]  }
   0x6   :  { %v18_v14 = vmul.f32 0.05, %v16_v13  ;;  %v594_v15 = vld [vmem:[%s801_s2 + $0x60] ss:$8 sps:$4 sm:$0xff]   ;;  %v597_v20 = vld [vmem:[%s801_s2 + $0x70] ss:$8 sps:$4 sm:$0xff]  }
   0x7   :  { %296 = vmatpush1.bf16.msra.mxu0 %v579_v3  ;;  %558 = vmatpush1.bf16.msra.mxu1 %v579_v3  ;;  %v598_v21 = vld [vmem:[%s801_s2 + $0x84] ss:$8 sps:$4 sm:$0xff]   ;;  %v705_v23 = vshrl.u32 %v36_v18, 7  ;;  %v600_v25 = vld [vmem:[%s801_s2 + $0x80] ss:$8 sps:$4 sm:$0xff]   ;;  %v30_v39 = vld [vmem:[%s803_s0 + $0x18] sm:$0xff] }
   0x8   :  { %297 = vmatprep.subr.bf16.mxu0 %v580_v4  ;;  %543 = vmatprep.subr.bf16.mxu1 %v580_v4  ;;  %v19_v17 = vmul.f32 %v18_v14, %v18_v14  ;;  %v601_v26 = vld [vmem:[%s801_s2 + $0x94] ss:$8 sps:$4 sm:$0xff]   ;;  %v603_v29 = vld [vmem:[%s801_s2 + $0x90] ss:$8 sps:$4 sm:$0xff]   ;;  %v604_v30 = vld [vmem:[%s801_s2 + $0xa4] ss:$8 sps:$4 sm:$0xff]  }
   0x9   :  { %v42_v28 = vsub.s32 2, %v705_v23  ;;  %v38_v31 = vsub.s32 0, %v705_v23  ;;  %v606_v33 = vld [vmem:[%s801_s2 + $0xa0] ss:$8 sps:$4 sm:$0xff]   ;;  %v607_v34 = vld [vmem:[%s801_s2 + $0xb4] ss:$8 sps:$4 sm:$0xff]  }
   0xa   :  { %v21_v19 = vrot.slane %v19_v17, 7  ;;  %v28_v37 = vld [vmem:[%s803_s0 + $0x8] sm:$0xff]  ;;  %v69_v38 = vsub.s32 3, %v705_v23  ;;  %v65_v40 = vsub.s32 1, %v705_v23  ;;  %v34_v42 = vld [vmem:[%s803_s0 + $0x38] sm:$0xff]  ;;  %v27_v52 = vld [vmem:[%s803_s0] sm:$0xff] }
   0xb   :  { %298 = vmatpush1.bf16.msra.mxu0 %v582_v5  ;;  %559 = vmatpush1.bf16.msra.mxu1 %v582_v5  ;;  %v43_v32 = vrot.slane %v18_v14, %v42_v28  ;;  %v39_v36 = vrot.slane %v18_v14, %v38_v31  ;;  %v32_v41 = vld [vmem:[%s803_s0 + $0x28] sm:$0xff]  ;;  %v609_v43 = vld [vmem:[%s801_s2 + $0xb0] ss:$8 sps:$4 sm:$0xff]   ;;  %v31_v57 = vld [vmem:[%s803_s0 + $0x20] sm:$0xff]  ;;  %v378_v28 = vadd.s32 16, %v705_v23  ;;  %vm443_vm1 = vcmp.lt.s32.totalorder %v36_v18, 256 }
   0xc   :  { %299 = vmatprep.subr.bf16.mxu0 %v583_v6  ;;  %544 = vmatprep.subr.bf16.mxu1 %v583_v6  ;;  %v23_v22 = vsub.f32 %v18_v14, %v21_v19  ;;  %v610_v45 = vld [vmem:[%s801_s2 + $0xc4] ss:$8 sps:$4 sm:$0xff]   ;;  %v612_v53 = vld [vmem:[%s801_s2 + $0xc0] ss:$8 sps:$4 sm:$0xff]   ;;  %v29_v56 = vld [vmem:[%s803_s0 + $0x10] sm:$0xff] }
   0xd   :  { %v53_v35 = vrot.slane %v43_v32, %v38_v31  ;;  %v49_v47 = vrot.slane %v39_v36, %v38_v31  ;;  %v33_v58 = vld [vmem:[%s803_s0 + $0x30] sm:$0xff]  ;;  %v618_v17 = vld [vmem:[%s801_s2 + $0xe0] ss:$8 sps:$4 sm:$0xff]   ;;  %vm387_vm0 = vcmp.lt.s32.totalorder %v378_v28, 20 }
   0xe   :  { %v24_v24 = vmax.f32 %v23_v22, 0.0  ;;  %v613_v59 = vld [vmem:[%s801_s2 + $0xd4] ss:$8 sps:$4 sm:$0xff]   ;;  %v615_v5 = vld [vmem:[%s801_s2 + $0xd0] ss:$8 sps:$4 sm:$0xff]  }
   0xf   :  { %300 = vmatpush1.bf16.msra.mxu0 %v585_v7  ;;  %560 = vmatpush1.bf16.msra.mxu1 %v585_v7  ;;  %v55_v46 = vsub.f32 %v28_v37, %v53_v35  ;;  %v57_v48 = vsub.f32 %v30_v39, %v53_v35  ;;  %v59_v50 = vsub.f32 %v32_v41, %v53_v35  ;;  %v619_v19 = vld [vmem:[%s801_s2 + $0xf4] ss:$8 sps:$4 sm:$0xff]  }
  0x10   :  { %301 = vmatprep.subr.bf16.mxu0 %v586_v8  ;;  %545 = vmatprep.subr.bf16.mxu1 %v586_v8  ;;  %v25_v27 = vadd.f32 1e-05, %v24_v24  ;;  %v61_v51 = vsub.f32 %v34_v42, %v53_v35  ;;  %v54_v60 = vsub.f32 %v27_v52, %v49_v47  ;;  %v56_v1 = vsub.f32 %v29_v56, %v49_v47 }
  0x11   :  { %v58_v3 = vsub.f32 %v31_v57, %v49_v47  ;;  %v60_v4 = vsub.f32 %v33_v58, %v49_v47 }
  0x12   :  { %622 = vrsqrt.f32 %v25_v27 }
  0x13   :  { %302 = vmatpush1.bf16.msra.mxu0 %v588_v9  ;;  %561 = vmatpush1.bf16.msra.mxu1 %v588_v9 }
  0x14   :  { %303 = vmatprep.subr.bf16.mxu0 %v589_v10  ;;  %546 = vmatprep.subr.bf16.mxu1 %v589_v10  ;;  %v616_v10 = vld [vmem:[%s801_s2 + $0xe4] ss:$8 sps:$4 sm:$0xff]  }
  0x17   :  { %304 = vmatpush1.bf16.msra.mxu0 %v591_v11  ;;  %562 = vmatpush1.bf16.msra.mxu1 %v591_v11 }
  0x18   :  { %305 = vmatprep.subr.bf16.mxu0 %v592_v12  ;;  %547 = vmatprep.subr.bf16.mxu1 %v592_v12 }
  0x1b   :  { %306 = vmatpush1.bf16.msra.mxu0 %v594_v15  ;;  %563 = vmatpush1.bf16.msra.mxu1 %v594_v15 }
  0x1c   :  { %307 = vmatprep.subr.bf16.mxu0 %v595_v16  ;;  %548 = vmatprep.subr.bf16.mxu1 %v595_v16  ;;  %v623_v44 = vpop.eup %622 }
  0x1d   :  { %v70_v49 = vrot.slane %v623_v44, %v69_v38  ;;  %v66_v54 = vrot.slane %v623_v44, %v65_v40 }
  0x1f   :  { %308 = vmatpush1.bf16.msra.mxu0 %v597_v20  ;;  %564 = vmatpush1.bf16.msra.mxu1 %v597_v20  ;;  %v80_v55 = vrot.slane %v70_v49, %v65_v40  ;;  %v76_v2 = vrot.slane %v66_v54, %v65_v40 }
  0x20   :  { %309 = vmatprep.subr.bf16.mxu0 %v598_v21  ;;  %549 = vmatprep.subr.bf16.mxu1 %v598_v21 }
  0x21   :  { %v82_v61 = vmul.f32 %v80_v55, %v55_v46  ;;  %v84_v62 = vmul.f32 %v80_v55, %v57_v48  ;;  %v86_v63 = vmul.f32 %v80_v55, %v59_v50  ;;  %v88_v0 = vmul.f32 %v80_v55, %v61_v51 }
  0x22   :  { %v81_v13 = vmul.f32 %v76_v2, %v54_v60  ;;  %v83_v14 = vmul.f32 %v76_v2, %v56_v1  ;;  %v85_v15 = vmul.f32 %v76_v2, %v58_v3  ;;  %v87_v16 = vmul.f32 %v76_v2, %v60_v4 }
  0x23   :  { %310 = vmatpush1.bf16.msra.mxu0 %v600_v25  ;;  %565 = vmatpush1.bf16.msra.mxu1 %v600_v25  ;;  %v90_v6 = vmax.f32 %v82_v61, 0.0  ;;  %v92_v7 = vmax.f32 %v84_v62, 0.0  ;;  %v94_v8 = vmax.f32 %v86_v63, 0.0  ;;  %v96_v9 = vmax.f32 %v88_v0, 0.0  ;;  %v621_v25 = vld [vmem:[%s801_s2 + $0xf0] ss:$8 sps:$4 sm:$0xff]  }
  0x24   :  { %311 = vmatprep.subr.bf16.mxu0 %v601_v26  ;;  %550 = vmatprep.subr.bf16.mxu1 %v601_v26  ;;  %v89_v20 = vmax.f32 %v81_v13, 0.0  ;;  %v91_v21 = vmax.f32 %v83_v14, 0.0  ;;  %v93_v22 = vmax.f32 %v85_v15, 0.0  ;;  %v95_v24 = vmax.f32 %v87_v16, 0.0 }
  0x25   :  { %v98_v11 = vpack.c.bf16 %v92_v7, %v90_v6  ;;  %v100_v12 = vpack.c.bf16 %v96_v9, %v94_v8  ;;  %v624_v62 = vmov 1966171168  }
  0x26   :  { %v97_v26 = vpack.c.bf16 %v91_v21, %v89_v20  ;;  %v99_v27 = vpack.c.bf16 %v95_v24, %v93_v22  ;;  %v427_v63 = vunpack.c.l.s4 %v624_v62 }
  0x27   :  { %312 = vmatpush1.bf16.msra.mxu0 %v603_v29  ;;  %566 = vmatpush1.bf16.msra.mxu1 %v603_v29 }
  0x28   :  { %313 = vmatprep.subr.bf16.mxu0 %v604_v30  ;;  %551 = vmatprep.subr.bf16.mxu1 %v604_v30  ;;  %v428_v8 = vunpack.c.0.s8 %v427_v63 }
  0x29   :  { %325 = vmatprep.mubr.bf16.mxu0 %v98_v11  ;;  %335 = vmatprep.mubr.bf16.mxu1 %v100_v12 }
  0x2b   :  { %314 = vmatpush1.bf16.msra.mxu0 %v606_v33  ;;  %567 = vmatpush1.bf16.msra.mxu1 %v606_v33 }
  0x2c   :  { %315 = vmatprep.subr.bf16.mxu0 %v607_v34  ;;  %552 = vmatprep.subr.bf16.mxu1 %v607_v34 }
  0x2f   :  { %316 = vmatpush1.bf16.msra.mxu0 %v609_v43  ;;  %568 = vmatpush1.bf16.msra.mxu1 %v609_v43 }
  0x30   :  { %317 = vmatprep.subr.bf16.mxu0 %v610_v45  ;;  %553 = vmatprep.subr.bf16.mxu1 %v610_v45 }
  0x33   :  { %318 = vmatpush1.bf16.msra.mxu0 %v612_v53  ;;  %569 = vmatpush1.bf16.msra.mxu1 %v612_v53 }
  0x34   :  { %319 = vmatprep.subr.bf16.mxu0 %v613_v59  ;;  %554 = vmatprep.subr.bf16.mxu1 %v613_v59 }
  0x37   :  { %320 = vmatpush1.bf16.msra.mxu0 %v615_v5  ;;  %570 = vmatpush1.bf16.msra.mxu1 %v615_v5 }
  0x38   :  { %321 = vmatprep.subr.bf16.mxu0 %v616_v10  ;;  %555 = vmatprep.subr.bf16.mxu1 %v616_v10 }
  0x3b   :  { %322 = vmatpush1.bf16.msra.mxu0 %v618_v17  ;;  %571 = vmatpush1.bf16.msra.mxu1 %v618_v17  ;;  %v431_v17 = vsub.s32 %v428_v8, %v705_v23 }
  0x3c   :  { %323 = vmatprep.subr.bf16.mxu0 %v619_v19  ;;  %556 = vmatprep.subr.bf16.mxu1 %v619_v19 }
  0x3f   :  { %324 = vmatpush1.bf16.msra.mxu0 %v621_v25  ;;  %572 = vmatpush1.bf16.msra.mxu1 %v621_v25 }
  0x42   :  { %326 = vmatmul.mubr.bf16.vlgmr.msra.gmra.mrb[0].mxu0 %v97_v26  ;;  %336 = vmatmul.mubr.bf16.vlgmr.msra.gmra.mrb[0].mxu1 %v99_v27 }
 0x115   :  { %v327_v29 = vpop.f32.mrb[0].mxu0  ;;  %v337_v30 = vpop.f32.mrb[0].mxu1 }
 0x116   :  { %v401_v31 = vsel %vm387_vm0, %v337_v30, 0.0  ;;  %v329_v32 = vpop.f32.mrb[1].mxu0  ;;  %v339_v33 = vpop.f32.mrb[1].mxu1  ;;  %v446_v34 = vmul.f32 %v327_v29, %v327_v29 }
 0x117   :  { %v450_v35 = vmul.f32 %v401_v31, %v401_v31  ;;  %v537_v36 = vpack.c.bf16 %v329_v32, %v327_v29  ;;  %v539_v37 = vpack.c.bf16 %v339_v33, %v337_v30  ;;  %v331_v38 = vpop.f32.mrb[2].mxu0  ;;  %v341_v39 = vpop.f32.mrb[2].mxu1  ;;  %v447_v40 = vmul.f32 %v329_v32, %v329_v32 }
 0x118   :  { %v402_v41 = vsel %vm387_vm0, %v339_v33, 0.0  ;;  %v405_v42 = vadd.f32 %v331_v38, %v327_v29  ;;  %v448_v43 = vmul.f32 %v331_v38, %v331_v38  ;;  %v333_v44 = vpop.f32.mrb[3].mxu0  ;;  %v343_v45 = vpop.f32.mrb[3].mxu1 }
 0x119   :  { %370 = vst [vmem:[%s804_s3] sm:$0xff] %v537_v36  ;;  %372 = vst [vmem:[%s804_s3 + $0x10] sm:$0xff] %v539_v37  ;;  %v451_v46 = vmul.f32 %v402_v41, %v402_v41  ;;  %v538_v47 = vpack.c.bf16 %v333_v44, %v331_v38  ;;  %v414_v48 = vadd.f32 %v333_v44, %v329_v32 }
 0x11a   :  { %v449_v49 = vmul.f32 %v333_v44, %v333_v44  ;;  %v406_v50 = vadd.f32 %v405_v42, %v401_v31  ;;  %v454_v51 = vadd.f32 %v448_v43, %v446_v34  ;;  %v540_v52 = vpack.c.bf16 %v343_v45, %v341_v39 }
 0x11b   :  { %371 = vst [vmem:[%s804_s3 + $0x8] sm:$0xff] %v538_v47  ;;  %v415_v53 = vadd.f32 %v414_v48, %v402_v41 }
 0x11c   :  { %v463_v54 = vadd.f32 %v449_v49, %v447_v40  ;;  %v408_v55 = vrot.slane %v406_v50, 4  ;;  %v455_v56 = vadd.f32 %v454_v51, %v450_v35  ;;  %373 = vst [vmem:[%s804_s3 + $0x18] sm:$0xff] %v540_v52 }
 0x11d   :  { %v417_v57 = vrot.slane %v415_v53, 4 }
 0x11e   :  { %v464_v58 = vadd.f32 %v463_v54, %v451_v46  ;;  %v409_v59 = vadd.f32 %v408_v55, %v406_v50  ;;  %v457_v60 = vrot.slane %v455_v56, 4 }
 0x11f   :  { %v418_v61 = vadd.f32 %v417_v57, %v415_v53 }
 0x120   :  { %v466_v0 = vrot.slane %v464_v58, 4  ;;  %v410_v1 = vrot.slane %v409_v59, 2  ;;  %v458_v2 = vadd.f32 %v457_v60, %v455_v56 }
 0x121   :  { %v419_v3 = vrot.slane %v418_v61, 2 }
 0x122   :  { %v467_v4 = vadd.f32 %v466_v0, %v464_v58  ;;  %v411_v5 = vadd.f32 %v410_v1, %v409_v59  ;;  %v459_v6 = vrot.slane %v458_v2, 2 }
 0x123   :  { %v420_v7 = vadd.f32 %v419_v3, %v418_v61 }
 0x124   :  { %v468_v9 = vrot.slane %v467_v4, 2  ;;  %v412_v10 = vrot.slane %v411_v5, 1  ;;  %v460_v11 = vadd.f32 %v459_v6, %v458_v2 }
 0x125   :  { %v421_v12 = vrot.slane %v420_v7, 1 }
 0x126   :  { %v469_v13 = vadd.f32 %v468_v9, %v467_v4  ;;  %v413_v14 = vadd.f32 %v412_v10, %v411_v5  ;;  %v461_v15 = vrot.slane %v460_v11, 1 }
 0x127   :  { %v422_v16 = vadd.f32 %v421_v12, %v420_v7 }
 0x128   :  { %v470_v19 = vrot.slane %v469_v13, 1  ;;  %v462_v20 = vadd.f32 %v461_v15, %v460_v11 }
 0x129   :  { %v425_v21 = vcombine.low %v413_v14, %v422_v16 }
 0x12a   :  { %v471_v22 = vadd.f32 %v470_v19, %v469_v13 }
 0x12b   :  { %v432_v24 = vrot.slane %v425_v21, %v431_v17 }
 0x12c   :  { %v474_v25 = vcombine.low %v462_v20, %v471_v22 }
 0x12d   :  { %v439_v26 = vrot.slane %v432_v24, %v431_v17 }
 0x12e   :  { %v481_v27 = vrot.slane %v474_v25, %v431_v17 }
 0x12f   :  { %445 = vst.msk [vmem:[%s805_s4] ss:$2 sm:$0x3] %vm443_vm1, %v439_v26 }
 0x130   :  { %v488_v28 = vrot.slane %v481_v27, %v431_v17 }
 0x132   :  { %536 = vst.msk [vmem:[%s805_s4 + $0x1] ss:$2 sm:$0x3] %vm443_vm1, %v488_v28 }

// kernel: projection_forward.4
= control target key start
LH: loop header
LB: loop body
LE: loop exit
PB: predicated region body
PF: predicated region fallthrough
CT: control target
= control target key end

     0   :  { %10 = vsyncpa [#allocation3], 0  ;;  %s380_s15 = smov [#allocation2]   ;;  %s479_s0 = inlined_call_operand.vmem [shape: f32[32,128], index: 0, kind: input, shape index: {}]   ;;  %s480_s1 = inlined_call_operand.hbm [shape: f32[128,256], index: 1, kind: input, shape index: {}]   ;;  %s481_s2 = inlined_call_operand.vmem [shape: f32[1,256], index: 2, kind: input, shape index: {}]   ;;  %s482_s3 = inlined_call_operand.vmem [shape: f32[32,256], index: 3, kind: output, shape index: {0}]   ;;  %s483_s4 = inlined_call_operand.vmem [shape: f32[1,2,256], index: 4, kind: output, shape index: {1}]  }
   0x1   :  { %s18_s16 = sshll.u32 %s380_s15, 4  ;;  %s356_s19 = scalar_lea.hbm %s480_s1, 4096  ;;  %s19_s16 = int_to_ptr.vmem [resolvable:$true] %s18_s16 }
   0x2   :  { %p357_p0 = scmp.ne.s32.totalorder %s480_s1, %s356_s19  ;;  %p360_p1 = scmp.lt.u32.totalorder %s356_s19, %s480_s1 }
   0x4   :  { %p362_p2 = pnand %p360_p1, %p357_p0 }
   0x6   :  { %365 = shalt.err (!%p362_p2)
}
   0x7   :  { %s366_s24 = scalar_lea.vmem %s19_s16, 4096  ;;  %p371_p4 = scmp.lt.s32.totalorder %s19_s16, %s19_s16 }
   0x8   :  { %p367_p3 = scmp.ne.s32.totalorder %s19_s16, %s366_s24  ;;  %p372_p5 = scmp.lt.s32.totalorder %s366_s24, %s366_s24 }
   0xa   :  { %p373_p6 = por %p372_p5, %p371_p4 }
   0xc   :  { %p374_p7 = pnand %p373_p6, %p367_p3 }
   0xe   :  { %377 = shalt.err (!%p374_p7)
}
   0xf   :  { %s381_s25 = smov 256   ;;  %s382_s26 = smov 16  }
  0x10   :  { %24 = dma.hbm_to_vmem [thread:$0]  %s480_s1, 4096, %s19_s16, [#allocation3], %s381_s25, %s381_s25, %s382_s26  }
  0x11   :  { %378 = dma.done.wait [#allocation3], 4096  }
  0x12   :  { %379 = vsyncadd [#allocation3], 4294963200  ;;  %v383_v0 = vmov 0.0   ;;  %v35_v1 = vld [vmem:[#allocation2 + $0x8] sm:$0xff]  ;;  %v37_v2 = vld [vmem:[#allocation2 + $0x18] sm:$0xff]  ;;  %v68_v53 = vlaneseq }
  0x13   :  { %142 = vmatprep.mubr.f32.mxu0 %v383_v0  ;;  %154 = vmatprep.mubr.f32.mxu1 %v383_v0  ;;  %v34_v3 = vld [vmem:[#allocation2] sm:$0xff]  ;;  %v303_v4 = vpack.c.bf16 %v37_v2, %v35_v1  ;;  %v36_v5 = vld [vmem:[#allocation2 + $0x10] sm:$0xff]  ;;  %v39_v6 = vld [vmem:[#allocation2 + $0x28] sm:$0xff] }
  0x14   :  { %v41_v7 = vld [vmem:[#allocation2 + $0x38] sm:$0xff]  ;;  %v305_v8 = vpack.c.bf16 %v36_v5, %v34_v3  ;;  %v38_v10 = vld [vmem:[#allocation2 + $0x20] sm:$0xff]  ;;  %v40_v11 = vld [vmem:[#allocation2 + $0x30] sm:$0xff]  ;;  %v439_v54 = vshrl.u32 %v68_v53, 7  ;;  %vm244_vm1 = vcmp.lt.s32.totalorder %v68_v53, 256 }
  0x15   :  { %v307_v9 = vpack.c.bf16 %v41_v7, %v39_v6  ;;  %v43_v12 = vld [vmem:[#allocation2 + $0x48] sm:$0xff]  ;;  %304 = vmatprep.subr.bf16.mxu0 %v303_v4  ;;  %335 = vmatprep.subr.bf16.mxu1 %v303_v4  ;;  %v45_v13 = vld [vmem:[#allocation2 + $0x58] sm:$0xff]  ;;  %v309_v14 = vpack.c.bf16 %v40_v11, %v38_v10  ;;  %v42_v16 = vld [vmem:[#allocation2 + $0x40] sm:$0xff] }
  0x16   :  { %306 = vmatpush1.bf16.msra.mxu0 %v305_v8  ;;  %343 = vmatpush1.bf16.msra.mxu1 %v305_v8  ;;  %v311_v15 = vpack.c.bf16 %v45_v13, %v43_v12  ;;  %v44_v17 = vld [vmem:[#allocation2 + $0x50] sm:$0xff]  ;;  %v47_v18 = vld [vmem:[#allocation2 + $0x68] sm:$0xff]  ;;  %v49_v19 = vld [vmem:[#allocation2 + $0x78] sm:$0xff]  ;;  %v70_v55 = vsub.s32 0, %v439_v54  ;;  %v74_v57 = vsub.s32 1, %v439_v54  ;;  %v179_v59 = vadd.s32 16, %v439_v54 }
  0x17   :  { %308 = vmatprep.subr.bf16.mxu0 %v307_v9  ;;  %336 = vmatprep.subr.bf16.mxu1 %v307_v9  ;;  %v313_v20 = vpack.c.bf16 %v44_v17, %v42_v16  ;;  %v315_v21 = vpack.c.bf16 %v49_v19, %v47_v18  ;;  %v46_v22 = vld [vmem:[#allocation2 + $0x60] sm:$0xff]  ;;  %v48_v23 = vld [vmem:[#allocation2 + $0x70] sm:$0xff]  ;;  %v51_v24 = vld [vmem:[#allocation2 + $0x88] sm:$0xff] }
  0x18   :  { %v53_v25 = vld [vmem:[#allocation2 + $0x98] sm:$0xff]  ;;  %v317_v26 = vpack.c.bf16 %v48_v23, %v46_v22  ;;  %v50_v28 = vld [vmem:[#allocation2 + $0x80] sm:$0xff]  ;;  %v52_v29 = vld [vmem:[#allocation2 + $0x90] sm:$0xff]  ;;  %vm188_vm0 = vcmp.lt.s32.totalorder %v179_v59, 20 }
  0x19   :  { %v319_v27 = vpack.c.bf16 %v53_v25, %v51_v24  ;;  %v55_v30 = vld [vmem:[#allocation2 + $0xa8] sm:$0xff]  ;;  %v57_v31 = vld [vmem:[#allocation2 + $0xb8] sm:$0xff]  ;;  %v321_v32 = vpack.c.bf16 %v52_v29, %v50_v28  ;;  %v54_v34 = vld [vmem:[#allocation2 + $0xa0] sm:$0xff] }
  0x1a   :  { %310 = vmatpush1.bf16.msra.mxu0 %v309_v14  ;;  %344 = vmatpush1.bf16.msra.mxu1 %v309_v14  ;;  %v323_v33 = vpack.c.bf16 %v57_v31, %v55_v30  ;;  %v56_v35 = vld [vmem:[#allocation2 + $0xb0] sm:$0xff]  ;;  %v59_v36 = vld [vmem:[#allocation2 + $0xc8] sm:$0xff]  ;;  %v61_v37 = vld [vmem:[#allocation2 + $0xd8] sm:$0xff] }
  0x1b   :  { %312 = vmatprep.subr.bf16.mxu0 %v311_v15  ;;  %337 = vmatprep.subr.bf16.mxu1 %v311_v15  ;;  %v325_v38 = vpack.c.bf16 %v56_v35, %v54_v34  ;;  %v327_v39 = vpack.c.bf16 %v61_v37, %v59_v36  ;;  %v58_v40 = vld [vmem:[#allocation2 + $0xc0] sm:$0xff]  ;;  %v60_v41 = vld [vmem:[#allocation2 + $0xd0] sm:$0xff]  ;;  %v63_v42 = vld [vmem:[#allocation2 + $0xe8] sm:$0xff]  ;;  %v384_v34 = vmov 1966171168  }
  0x1c   :  { %v65_v43 = vld [vmem:[#allocation2 + $0xf8] sm:$0xff]  ;;  %v329_v44 = vpack.c.bf16 %v60_v41, %v58_v40  ;;  %v62_v46 = vld [vmem:[#allocation2 + $0xe0] sm:$0xff]  ;;  %v64_v47 = vld [vmem:[#allocation2 + $0xf0] sm:$0xff]  ;;  %v228_v35 = vunpack.c.l.s4 %v384_v34 }
  0x1d   :  { %v331_v45 = vpack.c.bf16 %v65_v43, %v63_v42  ;;  %v333_v48 = vpack.c.bf16 %v64_v47, %v62_v46  ;;  %v30_v49 = vld [vmem:[%s479_s0] sm:$0xff]  ;;  %v32_v50 = vld [vmem:[%s479_s0 + $0x10] sm:$0xff]  ;;  %v31_v51 = vld [vmem:[%s479_s0 + $0x8] sm:$0xff] }
  0x1e   :  { %314 = vmatpush1.bf16.msra.mxu0 %v313_v20  ;;  %345 = vmatpush1.bf16.msra.mxu1 %v313_v20  ;;  %v33_v52 = vld [vmem:[%s479_s0 + $0x18] sm:$0xff]  ;;  %v66_v56 = vld [vmem:[%s481_s2] sm:$0x3] }
  0x1f   :  { %316 = vmatprep.subr.bf16.mxu0 %v315_v21  ;;  %338 = vmatprep.subr.bf16.mxu1 %v315_v21  ;;  %v71_v58 = vrot.slane %v66_v56, %v70_v55  ;;  %v75_v60 = vrot.slane %v66_v56, %v74_v57 }
  0x22   :  { %318 = vmatpush1.bf16.msra.mxu0 %v317_v26  ;;  %346 = vmatpush1.bf16.msra.mxu1 %v317_v26 }
  0x23   :  { %320 = vmatprep.subr.bf16.mxu0 %v319_v27  ;;  %339 = vmatprep.subr.bf16.mxu1 %v319_v27 }
  0x26   :  { %322 = vmatpush1.bf16.msra.mxu0 %v321_v32  ;;  %347 = vmatpush1.bf16.msra.mxu1 %v321_v32 }
  0x27   :  { %324 = vmatprep.subr.bf16.mxu0 %v323_v33  ;;  %340 = vmatprep.subr.bf16.mxu1 %v323_v33 }
  0x2a   :  { %326 = vmatpush1.bf16.msra.mxu0 %v325_v38  ;;  %348 = vmatpush1.bf16.msra.mxu1 %v325_v38 }
  0x2b   :  { %328 = vmatprep.subr.bf16.mxu0 %v327_v39  ;;  %341 = vmatprep.subr.bf16.mxu1 %v327_v39 }
  0x2e   :  { %330 = vmatpush1.bf16.msra.mxu0 %v329_v44  ;;  %349 = vmatpush1.bf16.msra.mxu1 %v329_v44  ;;  %v229_v44 = vunpack.c.0.s8 %v228_v35 }
  0x2f   :  { %332 = vmatprep.subr.bf16.mxu0 %v331_v45  ;;  %342 = vmatprep.subr.bf16.mxu1 %v331_v45 }
  0x30   :  { %v232_v55 = vsub.s32 %v229_v44, %v439_v54 }
  0x32   :  { %334 = vmatpush1.bf16.msra.mxu0 %v333_v48  ;;  %350 = vmatpush1.bf16.msra.mxu1 %v333_v48 }
  0x35   :  { %143 = vmatmul.mubr.f32.vlgmr.msra.gmra.mrb[0].mxu0 %v30_v49  ;;  %155 = vmatmul.mubr.f32.vlgmr.msra.gmra.mrb[0].mxu1 %v32_v50 }
  0x36   :  { %148 = vmatprep.mubr.f32.mxu0 %v383_v0  ;;  %160 = vmatprep.mubr.f32.mxu1 %v383_v0 }
  0x39   :  { %149 = vmatmul.mubr.f32.gmra.mrb[2].mxu0 %v31_v51  ;;  %161 = vmatmul.mubr.f32.gmra.mrb[2].mxu1 %v33_v52 }
 0x108   :  { %v144_v61 = vpop.f32.mrb[0].mxu0  ;;  %v156_v62 = vpop.f32.mrb[0].mxu1 }
 0x109   :  { %v145_v63 = vadd.f32 %v144_v61, %v71_v58  ;;  %v146_v0 = vpop.f32.mrb[1].mxu0  ;;  %v157_v1 = vadd.f32 %v156_v62, %v71_v58  ;;  %v158_v2 = vpop.f32.mrb[1].mxu1 }
 0x10a   :  { %v147_v3 = vadd.f32 %v146_v0, %v75_v60  ;;  %v159_v4 = vadd.f32 %v158_v2, %v75_v60 }
 0x10b   :  { %167 = vst [vmem:[%s482_s3] sm:$0xff] %v145_v63  ;;  %171 = vst [vmem:[%s482_s3 + $0x20] sm:$0xff] %v157_v1  ;;  %v202_v6 = vsel %vm188_vm0, %v157_v1, 0.0  ;;  %v247_v15 = vmul.f32 %v145_v63, %v145_v63 }
 0x10c   :  { %168 = vst [vmem:[%s482_s3 + $0x8] sm:$0xff] %v147_v3  ;;  %v150_v5 = vpop.f32.mrb[2].mxu0  ;;  %172 = vst [vmem:[%s482_s3 + $0x28] sm:$0xff] %v159_v4  ;;  %v162_v7 = vpop.f32.mrb[2].mxu1  ;;  %v203_v10 = vsel %vm188_vm0, %v159_v4, 0.0  ;;  %v251_v18 = vmul.f32 %v202_v6, %v202_v6  ;;  %v248_v19 = vmul.f32 %v147_v3, %v147_v3 }
 0x10d   :  { %v151_v8 = vadd.f32 %v150_v5, %v71_v58  ;;  %v152_v9 = vpop.f32.mrb[3].mxu0  ;;  %v163_v11 = vadd.f32 %v162_v7, %v71_v58  ;;  %v164_v12 = vpop.f32.mrb[3].mxu1  ;;  %v252_v22 = vmul.f32 %v203_v10, %v203_v10 }
 0x10e   :  { %v153_v13 = vadd.f32 %v152_v9, %v75_v60  ;;  %v165_v14 = vadd.f32 %v164_v12, %v75_v60 }
 0x10f   :  { %169 = vst [vmem:[%s482_s3 + $0x10] sm:$0xff] %v151_v8  ;;  %v206_v16 = vadd.f32 %v151_v8, %v145_v63  ;;  %v249_v17 = vmul.f32 %v151_v8, %v151_v8  ;;  %173 = vst [vmem:[%s482_s3 + $0x30] sm:$0xff] %v163_v11 }
 0x110   :  { %170 = vst [vmem:[%s482_s3 + $0x18] sm:$0xff] %v153_v13  ;;  %v215_v20 = vadd.f32 %v153_v13, %v147_v3  ;;  %v250_v21 = vmul.f32 %v153_v13, %v153_v13  ;;  %174 = vst [vmem:[%s482_s3 + $0x38] sm:$0xff] %v165_v14 }
 0x111   :  { %v255_v23 = vadd.f32 %v249_v17, %v247_v15  ;;  %v207_v24 = vadd.f32 %v206_v16, %v202_v6 }
 0x112   :  { %v264_v25 = vadd.f32 %v250_v21, %v248_v19  ;;  %v216_v26 = vadd.f32 %v215_v20, %v203_v10 }
 0x113   :  { %v209_v27 = vrot.slane %v207_v24, 4  ;;  %v256_v28 = vadd.f32 %v255_v23, %v251_v18 }
 0x114   :  { %v218_v29 = vrot.slane %v216_v26, 4  ;;  %v265_v30 = vadd.f32 %v264_v25, %v252_v22 }
 0x115   :  { %v210_v31 = vadd.f32 %v209_v27, %v207_v24  ;;  %v258_v32 = vrot.slane %v256_v28, 4 }
 0x116   :  { %v219_v33 = vadd.f32 %v218_v29, %v216_v26  ;;  %v267_v36 = vrot.slane %v265_v30, 4 }
 0x117   :  { %v211_v37 = vrot.slane %v210_v31, 2  ;;  %v259_v38 = vadd.f32 %v258_v32, %v256_v28 }
 0x118   :  { %v220_v39 = vrot.slane %v219_v33, 2  ;;  %v268_v40 = vadd.f32 %v267_v36, %v265_v30 }
 0x119   :  { %v212_v41 = vadd.f32 %v211_v37, %v210_v31  ;;  %v260_v42 = vrot.slane %v259_v38, 2 }
 0x11a   :  { %v221_v43 = vadd.f32 %v220_v39, %v219_v33  ;;  %v269_v45 = vrot.slane %v268_v40, 2 }
 0x11b   :  { %v213_v46 = vrot.slane %v212_v41, 1  ;;  %v261_v47 = vadd.f32 %v260_v42, %v259_v38 }
 0x11c   :  { %v222_v48 = vrot.slane %v221_v43, 1  ;;  %v270_v49 = vadd.f32 %v269_v45, %v268_v40 }
 0x11d   :  { %v214_v50 = vadd.f32 %v213_v46, %v212_v41  ;;  %v262_v51 = vrot.slane %v261_v47, 1 }
 0x11e   :  { %v223_v52 = vadd.f32 %v222_v48, %v221_v43  ;;  %v271_v56 = vrot.slane %v270_v49, 1 }
 0x11f   :  { %v263_v57 = vadd.f32 %v262_v51, %v261_v47 }
 0x120   :  { %v226_v58 = vcombine.low %v214_v50, %v223_v52  ;;  %v272_v59 = vadd.f32 %v271_v56, %v270_v49 }
 0x122   :  { %v233_v60 = vrot.slane %v226_v58, %v232_v55  ;;  %v275_v61 = vcombine.low %v263_v57, %v272_v59 }
 0x124   :  { %v240_v62 = vrot.slane %v233_v60, %v232_v55  ;;  %v282_v63 = vrot.slane %v275_v61, %v232_v55 }
 0x126   :  { %246 = vst.msk [vmem:[%s483_s4] ss:$2 sm:$0x3] %vm244_vm1, %v240_v62  ;;  %v289_v0 = vrot.slane %v282_v63, %v232_v55 }
 0x128   :  { %302 = vst.msk [vmem:[%s483_s4 + $0x1] ss:$2 sm:$0x3] %vm244_vm1, %v289_v0 }
 0x129   :  { %301 = vsyncpa [#allocation3], 1 }

// kernel: projection_forward.7
= control target key start
LH: loop header
LB: loop body
LE: loop exit
PB: predicated region body
PF: predicated region fallthrough
CT: control target
= control target key end

     0   :  { %v30_v4 = vlaneseq  ;;  %s105_s1 = inlined_call_operand.vmem [shape: f32[1,2,128], index: 1, kind: input, shape index: {}]   ;;  %s106_s0 = inlined_call_operand.vmem [shape: bf16[32,128], index: 0, kind: input, shape index: {}]   ;;  %s107_s2 = inlined_call_operand.vmem [shape: f32[32,128], index: 2, kind: output, shape index: {}]  }
   0x1   :  { %v11_v0 = vld [vmem:[%s105_s1] sm:$0x3]  ;;  %v66_v11 = vld [vmem:[%s106_s0 + $0x8] sm:$0xff]  }
   0x2   :  { %v13_v1 = vmul.f32 0.05, %v11_v0  ;;  %v31_v7 = vshrl.u32 %v30_v4, 7  ;;  %v59_v9 = vld [vmem:[%s106_s0] sm:$0xff]   ;;  %v64_v15 = vunpack.c.l.bf16 %v66_v11  ;;  %v65_v16 = vunpack.c.h.bf16 %v66_v11 }
   0x3   :  { %v60_v12 = vunpack.c.l.bf16 %v59_v9  ;;  %v61_v14 = vunpack.c.h.bf16 %v59_v9 }
   0x4   :  { %v14_v2 = vmul.f32 %v13_v1, %v13_v1  ;;  %v32_v10 = vsub.s32 0, %v31_v7  ;;  %v40_v17 = vsub.s32 1, %v31_v7 }
   0x6   :  { %v16_v3 = vrot.slane %v14_v2, 7  ;;  %v33_v13 = vrot.slane %v13_v1, %v32_v10 }
   0x8   :  { %v18_v5 = vsub.f32 %v13_v1, %v16_v3  ;;  %v34_v18 = vsub.f32 %v60_v12, %v33_v13  ;;  %v35_v19 = vsub.f32 %v61_v14, %v33_v13  ;;  %v36_v20 = vsub.f32 %v64_v15, %v33_v13 }
   0x9   :  { %v37_v21 = vsub.f32 %v65_v16, %v33_v13 }
   0xa   :  { %v19_v6 = vmax.f32 %v18_v5, 0.0 }
   0xc   :  { %v20_v8 = vadd.f32 1e-05, %v19_v6 }
   0xe   :  { %67 = vrsqrt.f32 %v20_v8 }
  0x18   :  { %v68_v22 = vpop.eup %67 }
  0x19   :  { %v41_v23 = vrot.slane %v68_v22, %v40_v17 }
  0x1b   :  { %v42_v24 = vmul.f32 %v41_v23, %v34_v18  ;;  %v43_v25 = vmul.f32 %v41_v23, %v35_v19  ;;  %v44_v26 = vmul.f32 %v41_v23, %v36_v20  ;;  %v45_v27 = vmul.f32 %v41_v23, %v37_v21 }
  0x1d   :  { %v46_v28 = vmax.f32 %v42_v24, 0.0  ;;  %v47_v29 = vmax.f32 %v43_v25, 0.0  ;;  %v48_v30 = vmax.f32 %v44_v26, 0.0  ;;  %v49_v31 = vmax.f32 %v45_v27, 0.0 }
  0x1f   :  { %50 = vst [vmem:[%s107_s2] sm:$0xff] %v46_v28  ;;  %51 = vst [vmem:[%s107_s2 + $0x8] sm:$0xff] %v47_v29 }
  0x20   :  { %52 = vst [vmem:[%s107_s2 + $0x10] sm:$0xff] %v48_v30  ;;  %53 = vst [vmem:[%s107_s2 + $0x18] sm:$0xff] %v49_v31 }

// kernel: projection_forward.6
= control target key start
LH: loop header
LB: loop body
LE: loop exit
PB: predicated region body
PF: predicated region fallthrough
CT: control target
= control target key end

     0   :  { %v41_v15 = vlaneseq  ;;  %s566_s2 = inlined_call_operand.vmem [shape: bf16[256,128], index: 2, kind: input, shape index: {}]   ;;  %s567_s1 = inlined_call_operand.vmem [shape: f32[1,2,256], index: 1, kind: input, shape index: {}]   ;;  %s568_s0 = inlined_call_operand.vmem [shape: bf16[32,256], index: 0, kind: input, shape index: {}]   ;;  %s569_s3 = inlined_call_operand.vmem [shape: bf16[32,128], index: 3, kind: output, shape index: {0}]   ;;  %s570_s4 = inlined_call_operand.vmem [shape: f32[1,2,128], index: 4, kind: output, shape index: {1}]  }
   0x1   :  { %v441_v0 = vld [vmem:[%s566_s2 + $0x40] sm:$0xff]   ;;  %v443_v2 = vld [vmem:[%s566_s2 + $0x48] sm:$0xff]   ;;  %v445_v4 = vld [vmem:[%s566_s2 + $0x50] sm:$0xff]  }
   0x2   :  { %v442_v1 = vld [vmem:[%s566_s2] sm:$0xff]   ;;  %397 = vmatprep.subr.bf16.mxu0 %v441_v0  ;;  %425 = vmatprep.subr.bf16.mxu1 %v441_v0  ;;  %v444_v3 = vld [vmem:[%s566_s2 + $0x8] sm:$0xff]   ;;  %v446_v5 = vld [vmem:[%s566_s2 + $0x10] sm:$0xff]   ;;  %v529_v20 = vshrl.u32 %v41_v15, 7 }
   0x3   :  { %398 = vmatpush3.bf16.msra.mxu0 %v442_v1  ;;  %433 = vmatpush3.bf16.msra.mxu1 %v442_v1  ;;  %v447_v6 = vld [vmem:[%s566_s2 + $0x58] sm:$0xff]   ;;  %v449_v8 = vld [vmem:[%s566_s2 + $0x60] sm:$0xff]   ;;  %v451_v10 = vld [vmem:[%s566_s2 + $0x68] sm:$0xff]  }
   0x4   :  { %399 = vmatprep.subr.bf16.mxu0 %v443_v2  ;;  %426 = vmatprep.subr.bf16.mxu1 %v443_v2  ;;  %v448_v7 = vld [vmem:[%s566_s2 + $0x18] sm:$0xff]   ;;  %v450_v9 = vld [vmem:[%s566_s2 + $0x20] sm:$0xff]   ;;  %v452_v13 = vld [vmem:[%s566_s2 + $0x28] sm:$0xff]   ;;  %v47_v25 = vsub.s32 2, %v529_v20  ;;  %v43_v26 = vsub.s32 0, %v529_v20  ;;  %v70_v36 = vsub.s32 1, %v529_v20 }
   0x5   :  { %v17_v11 = vld [vmem:[%s567_s1] sm:$0xf]  ;;  %v453_v16 = vld [vmem:[%s566_s2 + $0x70] sm:$0xff]   ;;  %v455_v21 = vld [vmem:[%s566_s2 + $0x78] sm:$0xff]   ;;  %v74_v38 = vsub.s32 3, %v529_v20 }
   0x6   :  { %v19_v12 = vmul.f32 0.05, %v17_v11  ;;  %v454_v18 = vld [vmem:[%s566_s2 + $0x30] sm:$0xff]   ;;  %v456_v23 = vld [vmem:[%s566_s2 + $0x38] sm:$0xff]   ;;  %v28_v28 = vld [vmem:[%s568_s0] sm:$0xff] }
   0x7   :  { %400 = vmatpush3.bf16.msra.mxu0 %v444_v3  ;;  %434 = vmatpush3.bf16.msra.mxu1 %v444_v3  ;;  %v29_v29 = vld [vmem:[%s568_s0 + $0x8] sm:$0xff]  ;;  %v30_v30 = vld [vmem:[%s568_s0 + $0x10] sm:$0xff]  ;;  %v31_v31 = vld [vmem:[%s568_s0 + $0x18] sm:$0xff]  ;;  %v33_v33 = vunpack.c.h.bf16 %v28_v28  ;;  %v32_v37 = vunpack.c.l.bf16 %v28_v28 }
   0x8   :  { %401 = vmatprep.subr.bf16.mxu0 %v445_v4  ;;  %427 = vmatprep.subr.bf16.mxu1 %v445_v4  ;;  %v20_v14 = vmul.f32 %v19_v12, %v19_v12  ;;  %v48_v27 = vrot.slane %v19_v12, %v47_v25  ;;  %v44_v32 = vrot.slane %v19_v12, %v43_v26  ;;  %v35_v34 = vunpack.c.h.bf16 %v29_v29 }
   0x9   :  { %v37_v39 = vunpack.c.h.bf16 %v30_v30  ;;  %v39_v40 = vunpack.c.h.bf16 %v31_v31  ;;  %v34_v41 = vunpack.c.l.bf16 %v29_v29  ;;  %v36_v42 = vunpack.c.l.bf16 %v30_v30 }
   0xa   :  { %v22_v17 = vrot.slane %v20_v14, 7  ;;  %v58_v35 = vrot.slane %v48_v27, %v43_v26  ;;  %v38_v43 = vunpack.c.l.bf16 %v31_v31  ;;  %v54_v44 = vrot.slane %v44_v32, %v43_v26 }
   0xb   :  { %402 = vmatpush3.bf16.msra.mxu0 %v446_v5  ;;  %435 = vmatpush3.bf16.msra.mxu1 %v446_v5  ;;  %v307_v14 = vadd.s32 16, %v529_v20 }
   0xc   :  { %403 = vmatprep.subr.bf16.mxu0 %v447_v6  ;;  %428 = vmatprep.subr.bf16.mxu1 %v447_v6  ;;  %v24_v19 = vsub.f32 %v19_v12, %v22_v17  ;;  %v60_v46 = vsub.f32 %v33_v33, %v58_v35  ;;  %v62_v47 = vsub.f32 %v35_v34, %v58_v35 }
   0xd   :  { %v64_v49 = vsub.f32 %v37_v39, %v58_v35  ;;  %v66_v50 = vsub.f32 %v39_v40, %v58_v35  ;;  %v59_v52 = vsub.f32 %v32_v37, %v54_v44  ;;  %v61_v53 = vsub.f32 %v34_v41, %v54_v44 }
   0xe   :  { %v25_v22 = vmax.f32 %v24_v19, 0.0  ;;  %v63_v54 = vsub.f32 %v36_v42, %v54_v44  ;;  %v65_v55 = vsub.f32 %v38_v43, %v54_v44  ;;  %vm316_vm0 = vcmp.lt.s32.totalorder %v307_v14, 20 }
   0xf   :  { %404 = vmatpush3.bf16.msra.mxu0 %v448_v7  ;;  %436 = vmatpush3.bf16.msra.mxu1 %v448_v7 }
  0x10   :  { %405 = vmatprep.subr.bf16.mxu0 %v449_v8  ;;  %429 = vmatprep.subr.bf16.mxu1 %v449_v8  ;;  %v26_v24 = vadd.f32 1e-05, %v25_v22 }
  0x12   :  { %457 = vrsqrt.f32 %v26_v24 }
  0x13   :  { %406 = vmatpush3.bf16.msra.mxu0 %v450_v9  ;;  %437 = vmatpush3.bf16.msra.mxu1 %v450_v9 }
  0x14   :  { %407 = vmatprep.subr.bf16.mxu0 %v451_v10  ;;  %430 = vmatprep.subr.bf16.mxu1 %v451_v10 }
  0x17   :  { %408 = vmatpush3.bf16.msra.mxu0 %v452_v13  ;;  %438 = vmatpush3.bf16.msra.mxu1 %v452_v13 }
  0x18   :  { %409 = vmatprep.subr.bf16.mxu0 %v453_v16  ;;  %431 = vmatprep.subr.bf16.mxu1 %v453_v16 }
  0x1b   :  { %410 = vmatpush3.bf16.msra.mxu0 %v454_v18  ;;  %439 = vmatpush3.bf16.msra.mxu1 %v454_v18 }
  0x1c   :  { %411 = vmatprep.subr.bf16.mxu0 %v455_v21  ;;  %432 = vmatprep.subr.bf16.mxu1 %v455_v21  ;;  %v458_v45 = vpop.eup %457 }
  0x1d   :  { %v75_v48 = vrot.slane %v458_v45, %v74_v38  ;;  %v71_v51 = vrot.slane %v458_v45, %v70_v36 }
  0x1f   :  { %412 = vmatpush3.bf16.msra.mxu0 %v456_v23  ;;  %440 = vmatpush3.bf16.msra.mxu1 %v456_v23  ;;  %v85_v56 = vrot.slane %v75_v48, %v70_v36  ;;  %v81_v57 = vrot.slane %v71_v51, %v70_v36 }
  0x21   :  { %v87_v58 = vmul.f32 %v85_v56, %v60_v46  ;;  %v89_v59 = vmul.f32 %v85_v56, %v62_v47  ;;  %v91_v60 = vmul.f32 %v85_v56, %v64_v49  ;;  %v93_v61 = vmul.f32 %v85_v56, %v66_v50 }
  0x22   :  { %v86_v62 = vmul.f32 %v81_v57, %v59_v52  ;;  %v88_v63 = vmul.f32 %v81_v57, %v61_v53  ;;  %v90_v0 = vmul.f32 %v81_v57, %v63_v54  ;;  %v92_v1 = vmul.f32 %v81_v57, %v65_v55 }
  0x23   :  { %v95_v2 = vmax.f32 %v87_v58, 0.0  ;;  %v97_v3 = vmax.f32 %v89_v59, 0.0  ;;  %v99_v4 = vmax.f32 %v91_v60, 0.0  ;;  %v101_v5 = vmax.f32 %v93_v61, 0.0 }
  0x24   :  { %v94_v6 = vmax.f32 %v86_v62, 0.0  ;;  %v96_v7 = vmax.f32 %v88_v63, 0.0  ;;  %v98_v8 = vmax.f32 %v90_v0, 0.0  ;;  %v100_v9 = vmax.f32 %v92_v1, 0.0 }
  0x25   :  { %v103_v10 = vpack.c.bf16 %v97_v3, %v95_v2  ;;  %v105_v11 = vpack.c.bf16 %v101_v5, %v99_v4 }
  0x26   :  { %v102_v12 = vpack.c.bf16 %v96_v7, %v94_v6  ;;  %v104_v13 = vpack.c.bf16 %v100_v9, %v98_v8 }
  0x27   :  { %266 = vmatprep.mubr.bf16.mxu0 %v103_v10  ;;  %274 = vmatprep.mubr.bf16.mxu1 %v105_v11 }
  0x28   :  { %267 = vmatmul.mubr.bf16.vlgmr.msra.gmra.mrb[0].mxu0 %v102_v12  ;;  %275 = vmatmul.mubr.bf16.vlgmr.msra.gmra.mrb[0].mxu1 %v104_v13 }
  0xfb   :  { %v413_v15 = vpop.f32.mrb[0].mxu0  ;;  %v419_v16 = vpop.f32.mrb[0].mxu1 }
  0xfc   :  { %v414_v17 = vpop.f32.mrb[1].mxu0  ;;  %v420_v18 = vpop.f32.mrb[1].mxu1 }
  0xfd   :  { %v415_v19 = vadd.f32 %v414_v17, %v413_v15  ;;  %v421_v21 = vadd.f32 %v420_v18, %v419_v16  ;;  %v416_v22 = vpop.f32.mrb[2].mxu0  ;;  %v422_v23 = vpop.f32.mrb[2].mxu1 }
  0xfe   :  { %v417_v24 = vpop.f32.mrb[3].mxu0  ;;  %v423_v25 = vpop.f32.mrb[3].mxu1 }
  0xff   :  { %v328_v26 = vsel %vm316_vm0, %v421_v21, 0.0  ;;  %v418_v27 = vadd.f32 %v417_v24, %v416_v22  ;;  %v424_v28 = vadd.f32 %v423_v25, %v422_v23  ;;  %v340_v29 = vmul.f32 %v415_v19, %v415_v19 }
 0x100   :  { %v342_v30 = vmul.f32 %v328_v26, %v328_v26 }
 0x101   :  { %v389_v31 = vpack.c.bf16 %v418_v27, %v415_v19  ;;  %v330_v32 = vadd.f32 %v418_v27, %v415_v19  ;;  %v341_v33 = vmul.f32 %v418_v27, %v418_v27  ;;  %v394_v20 = vpack.c.bf16 %v424_v28, %v421_v21 }
 0x103   :  { %v331_v34 = vadd.f32 %v330_v32, %v328_v26  ;;  %v344_v35 = vadd.f32 %v341_v33, %v340_v29  ;;  %390 = vst [vmem:[%s569_s3] sm:$0xff] %v389_v31   ;;  %396 = vst [vmem:[%s569_s3 + $0x8] sm:$0xff] %v394_v20  }
 0x105   :  { %v333_v36 = vrot.slane %v331_v34, 4  ;;  %v345_v37 = vadd.f32 %v344_v35, %v342_v30 }
 0x107   :  { %v334_v38 = vadd.f32 %v333_v36, %v331_v34  ;;  %v347_v39 = vrot.slane %v345_v37, 4 }
 0x109   :  { %v335_v40 = vrot.slane %v334_v38, 2  ;;  %v348_v41 = vadd.f32 %v347_v39, %v345_v37 }
 0x10b   :  { %v336_v42 = vadd.f32 %v335_v40, %v334_v38  ;;  %v349_v43 = vrot.slane %v348_v41, 2 }
 0x10d   :  { %v337_v44 = vrot.slane %v336_v42, 1  ;;  %v350_v45 = vadd.f32 %v349_v43, %v348_v41 }
 0x10f   :  { %v338_v46 = vadd.f32 %v337_v44, %v336_v42  ;;  %v351_v47 = vrot.slane %v350_v45, 1 }
 0x111   :  { %339 = vst [vmem:[%s570_s4] sm:$0x1] %v338_v46  ;;  %v352_v48 = vadd.f32 %v351_v47, %v350_v45 }
 0x113   :  { %353 = vst [vmem:[%s570_s4 + $0x1] sm:$0x1] %v352_v48 }

</bundles_post_ra>
